<compile_context>
chip_gen: v7x
topology: tpu7x:2x2x1
jax: 0.10.0
libtpu: 0.0.40
codegen_flags: <defaults>
</compile_context>

<pallas_src>
import functools

import jax
import jax.numpy as jnp
from jax.experimental import pallas as pl
from jax.experimental.pallas import tpu as pltpu


# ----------------------------------------------------------------------------
# Fused kernel: one-hot embedding/input-proj + RNN recurrence + output proj
# ----------------------------------------------------------------------------
def _fused_kernel(ids_ref, ptab_ref, whh_ref, bias_ref, h0_ref,
                  wout_ref, bout_ref,
                  logits_ref, hn_ref,
                  *, S, B_pad, V_pad, H):
    # 1) Embedding + input projection: one-hot (exact in bf16) against the
    #    precomputed (ebd @ W_ih) table -> all per-step pre-activations at once.
    ids = ids_ref[...]                                                # (S*Bp, 1) int32
    col = jax.lax.broadcasted_iota(jnp.int32, (S * B_pad, V_pad), 1)
    one_hot = (col == ids).astype(jnp.float32).astype(jnp.bfloat16)   # (S*Bp, Vp)
    pre_all = (
        jnp.dot(one_hot, ptab_ref[...], preferred_element_type=jnp.float32)
        + bias_ref[...]                                               # (1, H) bcast
    )                                                                 # (S*Bp, H) f32

    # Weights stay bf16 (MXU operands only); all VPU/EUP math stays f32.
    whh = whh_ref[...]                                                # (H, H)  bf16
    wout = wout_ref[...]                                              # (H, Vp) bf16
    bout = bout_ref[...]                                              # (1, Vp) f32

    # 2+3) Register-resident recurrence, fully unrolled with static indices;
    #      per-step output projection fused into the loop (hides under the
    #      dependent tanh/EUP chain), lane-dense per-step stores.
    # TODO(synk): could pin W_hh on the MXU with pltpu.matmul_push_rhs /
    # matmul_acc_lhs; skipped here -- left to Mosaic for this tiny RHS.
    h = h0_ref[...]                                                   # (Bp, H) f32
    for t in range(S):
        pre_t = pre_all[t * B_pad:(t + 1) * B_pad, :]                 # static slice
        h = jnp.tanh(
            pre_t + jnp.dot(h.astype(jnp.bfloat16), whh,
                            preferred_element_type=jnp.float32))
        logits_ref[t] = (
            jnp.dot(h.astype(jnp.bfloat16), wout,
                    preferred_element_type=jnp.float32) + bout
        ).astype(logits_ref.dtype)                                    # (Bp, Vp)
    hn_ref[...] = h.astype(hn_ref.dtype)


# ----------------------------------------------------------------------------
# Full TextGenerator forward
# ----------------------------------------------------------------------------
def text_generator_forward(params, inputs, hidden):
    """inputs: (B, S) int32 token ids; hidden: (1, B, 256).

    Returns (logits: (S*B, V), hidden: (1, B, 256)) -- matches the PyTorch
    module's output shapes exactly (seq-major flatten of the time-major RNN
    outputs).
    """
    B, S = inputs.shape
    V, E = params["ebd_weight"].shape
    H = params["rnn_w_hh_t"].shape[0]
    B_pad = max(8, ((B + 7) // 8) * 8)          # full sublanes
    V_pad = ((V + 127) // 128) * 128            # lane-dense one-hot / output width

    # --- parameter prep: constant-folded when params are closed over under jit
    proj = params["ebd_weight"] @ params["rnn_w_ih_t"]                 # (V, H) f32
    ptab = jnp.pad(proj, ((0, V_pad - V), (0, 0))).astype(jnp.bfloat16)
    whh = params["rnn_w_hh_t"].astype(jnp.bfloat16)
    wout = jnp.pad(params["out_w_t"], ((0, 0), (0, V_pad - V))).astype(jnp.bfloat16)
    bout = jnp.pad(params["out_bias"], ((0, 0), (0, V_pad - V)))       # f32
    bias = params["rnn_bias"]                                          # (1, H) f32

    # --- runtime inputs: cheap pads XLA fuses (no scatter .at[].set)
    ids_col = jnp.pad(inputs.T, ((0, 0), (0, B_pad - B))).reshape(S * B_pad, 1)
    h0_pad = jnp.pad(hidden[0], ((0, B_pad - B), (0, 0)))

    kernel = functools.partial(_fused_kernel, S=S, B_pad=B_pad, V_pad=V_pad, H=H)

    logits_pad, hn_pad = pl.pallas_call(
        kernel,
        out_shape=(
            jax.ShapeDtypeStruct((S, B_pad, V_pad), jnp.float32),
            jax.ShapeDtypeStruct((B_pad, H), jnp.float32),
        ),
        grid_spec=pltpu.PrefetchScalarGridSpec(
            num_scalar_prefetch=0,
            grid=(1,),
            in_specs=[
                pl.BlockSpec((S * B_pad, 1), lambda i: (0, 0)),   # token ids
                pl.BlockSpec((V_pad, E + (H - E)), lambda i: (0, 0))
                if False else pl.BlockSpec((V_pad, H), lambda i: (0, 0)),  # ebd@W_ih (bf16)
                pl.BlockSpec((H, H), lambda i: (0, 0)),           # W_hh^T (bf16)
                pl.BlockSpec((1, H), lambda i: (0, 0)),           # b_ih + b_hh (f32)
                pl.BlockSpec((B_pad, H), lambda i: (0, 0)),       # h0 (padded, f32)
                pl.BlockSpec((H, V_pad), lambda i: (0, 0)),       # W_out^T (padded, bf16)
                pl.BlockSpec((1, V_pad), lambda i: (0, 0)),       # b_out (padded, f32)
            ],
            out_specs=[
                pl.BlockSpec((S, B_pad, V_pad), lambda i: (0, 0, 0)),  # logits (padded)
                pl.BlockSpec((B_pad, H), lambda i: (0, 0)),            # final hidden
            ],
        ),
        compiler_params=pltpu.CompilerParams(
            dimension_semantics=("arbitrary",)),
    )(ids_col, ptab, whh, bias, h0_pad, wout, bout)

    logits = logits_pad[:, :B, :V].reshape(S * B, V)
    h_n = hn_pad[:B][None]                       # (1, B, 256)
    return logits, h_n


def init_params(key, vocab_size, embed_dim=128, hidden_dim=256):
    ks = jax.random.split(key, 7)
    scale = 0.05
    return {
        "ebd_weight": scale * jax.random.normal(ks[0], (vocab_size, embed_dim), jnp.float32),
        # stored pre-transposed so kernels compute x @ W^T as x @ W_t
        "rnn_w_ih_t": scale * jax.random.normal(ks[1], (embed_dim, hidden_dim), jnp.float32),
        "rnn_w_hh_t": scale * jax.random.normal(ks[2], (hidden_dim, hidden_dim), jnp.float32),
        "rnn_bias": (scale * jax.random.normal(ks[3], (1, hidden_dim), jnp.float32)
                     + scale * jax.random.normal(ks[4], (1, hidden_dim), jnp.float32)),
        "out_w_t": scale * jax.random.normal(ks[5], (hidden_dim, vocab_size), jnp.float32),
        "out_bias": scale * jax.random.normal(ks[6], (1, vocab_size), jnp.float32),
    }


def reference_forward(params, inputs, hidden):
    """Pure-JAX f32 reference (mirrors torch nn.RNN with tanh)."""
    embed = jnp.take(params["ebd_weight"], inputs, axis=0)
    x_tm = jnp.transpose(embed, (1, 0, 2))

    def step(h, x_t):
        h_new = jnp.tanh(x_t @ params["rnn_w_ih_t"]
                         + h @ params["rnn_w_hh_t"]
                         + params["rnn_bias"])
        return h_new, h_new

    h_n, out_tm = jax.lax.scan(step, hidden[0], x_tm)
    flat = out_tm.reshape(-1, out_tm.shape[-1])
    logits = flat @ params["out_w_t"] + params["out_bias"]
    return logits, h_n[None]


if __name__ == "__main__":
    VOCAB = 50
    BATCH = 2
    SEQ = 8

    key = jax.random.PRNGKey(0)
    pkey, ikey = jax.random.split(key)
    params = init_params(pkey, VOCAB)

    inputs = jax.random.randint(ikey, (BATCH, SEQ), 0, VOCAB, dtype=jnp.int32)
    hidden0 = jnp.zeros((1, BATCH, 256), jnp.float32)       # init_hidden(bs)

    fwd = jax.jit(functools.partial(text_generator_forward, params))
    logits, h_n = fwd(inputs, hidden0)
    jax.block_until_ready((logits, h_n))

    # sanity vs pure-JAX f32 reference (kernel uses bf16 MXU operands)
    ref_logits, ref_h = reference_forward(params, inputs, hidden0)
    assert logits.shape == (SEQ * BATCH, VOCAB)
    assert h_n.shape == (1, BATCH, 256)
    assert jnp.allclose(logits, ref_logits, atol=1e-2, rtol=1e-2)
    assert jnp.allclose(h_n, ref_h, atol=1e-2, rtol=1e-2)

    print("KERNEL_OK")
</pallas_src>

<mosaic_0001>
module attributes {stable_mosaic.version = 11 : i64} {
  func.func @_fused_kernel(%arg0: i32, %arg1: memref<64x1xi32, #tpu.memory_space<vmem>>, %arg2: memref<128x256xbf16, #tpu.memory_space<vmem>>, %arg3: memref<256x256xbf16, #tpu.memory_space<vmem>>, %arg4: memref<1x256xf32, #tpu.memory_space<vmem>>, %arg5: memref<8x256xf32, #tpu.memory_space<vmem>>, %arg6: memref<256x128xbf16, #tpu.memory_space<vmem>>, %arg7: memref<1x128xf32, #tpu.memory_space<vmem>>, %arg8: memref<8x8x128xf32, #tpu.memory_space<vmem>>, %arg9: memref<8x256xf32, #tpu.memory_space<vmem>>) attributes {dimension_semantics = [#tpu.dimension_semantics<arbitrary>], iteration_bounds = array<i64: 1>, scalar_prefetch = 0 : i64, scratch_operands = 0 : i64, tpu.core_type = #tpu.core_type<tc>, window_params = [{pipeline_mode = #tpu.pipeline_mode<synchronous>, transform_indices = @transform_0, window_bounds = array<i64: 64, 1>}, {pipeline_mode = #tpu.pipeline_mode<synchronous>, transform_indices = @transform_1, window_bounds = array<i64: 128, 256>}, {pipeline_mode = #tpu.pipeline_mode<synchronous>, transform_indices = @transform_2, window_bounds = array<i64: 256, 256>}, {pipeline_mode = #tpu.pipeline_mode<synchronous>, transform_indices = @transform_3, window_bounds = array<i64: 1, 256>}, {pipeline_mode = #tpu.pipeline_mode<synchronous>, transform_indices = @transform_4, window_bounds = array<i64: 8, 256>}, {pipeline_mode = #tpu.pipeline_mode<synchronous>, transform_indices = @transform_5, window_bounds = array<i64: 256, 128>}, {pipeline_mode = #tpu.pipeline_mode<synchronous>, transform_indices = @transform_6, window_bounds = array<i64: 1, 128>}, {pipeline_mode = #tpu.pipeline_mode<synchronous>, transform_indices = @transform_7, window_bounds = array<i64: 8, 8, 128>}, {pipeline_mode = #tpu.pipeline_mode<synchronous>, transform_indices = @transform_8, window_bounds = array<i64: 8, 256>}]} {
    %c0 = arith.constant 0 : index
    %c0_0 = arith.constant 0 : index
    %0 = vector.load %arg1[%c0, %c0_0] : memref<64x1xi32, #tpu.memory_space<vmem>>, vector<64x1xi32>
    %1 = tpu.iota {dimensions = array<i32: 1>} : vector<64x128xi32>
    %2 = vector.broadcast %0 : vector<64x1xi32> to vector<64x128xi32>
    %3 = arith.cmpi eq, %1, %2 : vector<64x128xi32>
    %4 = arith.extui %3 : vector<64x128xi1> to vector<64x128xi32>
    %5 = arith.sitofp %4 : vector<64x128xi32> to vector<64x128xf32>
    %6 = arith.truncf %5 : vector<64x128xf32> to vector<64x128xbf16>
    %c0_1 = arith.constant 0 : index
    %c0_2 = arith.constant 0 : index
    %7 = vector.load %arg2[%c0_1, %c0_2] : memref<128x256xbf16, #tpu.memory_space<vmem>>, vector<128x256xbf16>
    %cst = arith.constant dense<0.000000e+00> : vector<64x256xf32>
    %8 = tpu.matmul %6, %7, %cst {dimension_numbers = #tpu.dot_dimension_numbers<[1], [0], [0], [1], [0, 0, 1, 1], [], []>} : vector<64x128xbf16>, vector<128x256xbf16>, vector<64x256xf32> -> vector<64x256xf32>
    %c0_3 = arith.constant 0 : index
    %c0_4 = arith.constant 0 : index
    %9 = vector.load %arg4[%c0_3, %c0_4] : memref<1x256xf32, #tpu.memory_space<vmem>>, vector<1x256xf32>
    %10 = vector.broadcast %9 : vector<1x256xf32> to vector<64x256xf32>
    %11 = arith.addf %8, %10 : vector<64x256xf32>
    %c0_5 = arith.constant 0 : index
    %c0_6 = arith.constant 0 : index
    %12 = vector.load %arg3[%c0_5, %c0_6] : memref<256x256xbf16, #tpu.memory_space<vmem>>, vector<256x256xbf16>
    %c0_7 = arith.constant 0 : index
    %c0_8 = arith.constant 0 : index
    %13 = vector.load %arg6[%c0_7, %c0_8] : memref<256x128xbf16, #tpu.memory_space<vmem>>, vector<256x128xbf16>
    %c0_9 = arith.constant 0 : index
    %c0_10 = arith.constant 0 : index
    %14 = vector.load %arg7[%c0_9, %c0_10] : memref<1x128xf32, #tpu.memory_space<vmem>>, vector<1x128xf32>
    %c0_11 = arith.constant 0 : index
    %c0_12 = arith.constant 0 : index
    %15 = vector.load %arg5[%c0_11, %c0_12] : memref<8x256xf32, #tpu.memory_space<vmem>>, vector<8x256xf32>
    %16 = vector.extract_strided_slice %11 {offsets = [0, 0], sizes = [8, 256], strides = [1, 1]} : vector<64x256xf32> to vector<8x256xf32>
    %17 = arith.truncf %15 : vector<8x256xf32> to vector<8x256xbf16>
    %cst_13 = arith.constant dense<0.000000e+00> : vector<8x256xf32>
    %18 = tpu.matmul %17, %12, %cst_13 {dimension_numbers = #tpu.dot_dimension_numbers<[1], [0], [0], [1], [0, 0, 1, 1], [], []>} : vector<8x256xbf16>, vector<256x256xbf16>, vector<8x256xf32> -> vector<8x256xf32>
    %19 = arith.addf %16, %18 : vector<8x256xf32>
    %20 = math.tanh %19 : vector<8x256xf32>
    %21 = arith.truncf %20 : vector<8x256xf32> to vector<8x256xbf16>
    %cst_14 = arith.constant dense<0.000000e+00> : vector<8x128xf32>
    %22 = tpu.matmul %21, %13, %cst_14 {dimension_numbers = #tpu.dot_dimension_numbers<[1], [0], [0], [1], [0, 0, 1, 1], [], []>} : vector<8x256xbf16>, vector<256x128xbf16>, vector<8x128xf32> -> vector<8x128xf32>
    %23 = vector.broadcast %14 : vector<1x128xf32> to vector<8x128xf32>
    %24 = arith.addf %22, %23 : vector<8x128xf32>
    %c0_15 = arith.constant 0 : index
    %c0_16 = arith.constant 0 : index
    %c0_17 = arith.constant 0 : index
    %25 = vector.load %arg8[%c0_15, %c0_16, %c0_17] : memref<8x8x128xf32, #tpu.memory_space<vmem>>, vector<1x8x128xf32>
    %26 = vector.shape_cast %25 : vector<1x8x128xf32> to vector<8x128xf32>
    %27 = vector.shape_cast %24 : vector<8x128xf32> to vector<1x8x128xf32>
    tpu.vector_store %arg8[%c0_15, %c0_16, %c0_17], %27 {strides = array<i32>} : memref<8x8x128xf32, #tpu.memory_space<vmem>>, vector<1x8x128xf32>,
    %28 = vector.extract_strided_slice %11 {offsets = [8, 0], sizes = [8, 256], strides = [1, 1]} : vector<64x256xf32> to vector<8x256xf32>
    %29 = arith.truncf %20 : vector<8x256xf32> to vector<8x256xbf16>
    %cst_18 = arith.constant dense<0.000000e+00> : vector<8x256xf32>
    %30 = tpu.matmul %29, %12, %cst_18 {dimension_numbers = #tpu.dot_dimension_numbers<[1], [0], [0], [1], [0, 0, 1, 1], [], []>} : vector<8x256xbf16>, vector<256x256xbf16>, vector<8x256xf32> -> vector<8x256xf32>
    %31 = arith.addf %28, %30 : vector<8x256xf32>
    %32 = math.tanh %31 : vector<8x256xf32>
    %33 = arith.truncf %32 : vector<8x256xf32> to vector<8x256xbf16>
    %cst_19 = arith.constant dense<0.000000e+00> : vector<8x128xf32>
    %34 = tpu.matmul %33, %13, %cst_19 {dimension_numbers = #tpu.dot_dimension_numbers<[1], [0], [0], [1], [0, 0, 1, 1], [], []>} : vector<8x256xbf16>, vector<256x128xbf16>, vector<8x128xf32> -> vector<8x128xf32>
    %35 = vector.broadcast %14 : vector<1x128xf32> to vector<8x128xf32>
    %36 = arith.addf %34, %35 : vector<8x128xf32>
    %c1 = arith.constant 1 : index
    %c0_20 = arith.constant 0 : index
    %c0_21 = arith.constant 0 : index
    %37 = vector.load %arg8[%c1, %c0_20, %c0_21] : memref<8x8x128xf32, #tpu.memory_space<vmem>>, vector<1x8x128xf32>
    %38 = vector.shape_cast %37 : vector<1x8x128xf32> to vector<8x128xf32>
    %39 = vector.shape_cast %36 : vector<8x128xf32> to vector<1x8x128xf32>
    tpu.vector_store %arg8[%c1, %c0_20, %c0_21], %39 {strides = array<i32>} : memref<8x8x128xf32, #tpu.memory_space<vmem>>, vector<1x8x128xf32>,
    %40 = vector.extract_strided_slice %11 {offsets = [16, 0], sizes = [8, 256], strides = [1, 1]} : vector<64x256xf32> to vector<8x256xf32>
    %41 = arith.truncf %32 : vector<8x256xf32> to vector<8x256xbf16>
    %cst_22 = arith.constant dense<0.000000e+00> : vector<8x256xf32>
    %42 = tpu.matmul %41, %12, %cst_22 {dimension_numbers = #tpu.dot_dimension_numbers<[1], [0], [0], [1], [0, 0, 1, 1], [], []>} : vector<8x256xbf16>, vector<256x256xbf16>, vector<8x256xf32> -> vector<8x256xf32>
    %43 = arith.addf %40, %42 : vector<8x256xf32>
    %44 = math.tanh %43 : vector<8x256xf32>
    %45 = arith.truncf %44 : vector<8x256xf32> to vector<8x256xbf16>
    %cst_23 = arith.constant dense<0.000000e+00> : vector<8x128xf32>
    %46 = tpu.matmul %45, %13, %cst_23 {dimension_numbers = #tpu.dot_dimension_numbers<[1], [0], [0], [1], [0, 0, 1, 1], [], []>} : vector<8x256xbf16>, vector<256x128xbf16>, vector<8x128xf32> -> vector<8x128xf32>
    %47 = vector.broadcast %14 : vector<1x128xf32> to vector<8x128xf32>
    %48 = arith.addf %46, %47 : vector<8x128xf32>
    %c2 = arith.constant 2 : index
    %c0_24 = arith.constant 0 : index
    %c0_25 = arith.constant 0 : index
    %49 = vector.load %arg8[%c2, %c0_24, %c0_25] : memref<8x8x128xf32, #tpu.memory_space<vmem>>, vector<1x8x128xf32>
    %50 = vector.shape_cast %49 : vector<1x8x128xf32> to vector<8x128xf32>
    %51 = vector.shape_cast %48 : vector<8x128xf32> to vector<1x8x128xf32>
    tpu.vector_store %arg8[%c2, %c0_24, %c0_25], %51 {strides = array<i32>} : memref<8x8x128xf32, #tpu.memory_space<vmem>>, vector<1x8x128xf32>,
    %52 = vector.extract_strided_slice %11 {offsets = [24, 0], sizes = [8, 256], strides = [1, 1]} : vector<64x256xf32> to vector<8x256xf32>
    %53 = arith.truncf %44 : vector<8x256xf32> to vector<8x256xbf16>
    %cst_26 = arith.constant dense<0.000000e+00> : vector<8x256xf32>
    %54 = tpu.matmul %53, %12, %cst_26 {dimension_numbers = #tpu.dot_dimension_numbers<[1], [0], [0], [1], [0, 0, 1, 1], [], []>} : vector<8x256xbf16>, vector<256x256xbf16>, vector<8x256xf32> -> vector<8x256xf32>
    %55 = arith.addf %52, %54 : vector<8x256xf32>
    %56 = math.tanh %55 : vector<8x256xf32>
    %57 = arith.truncf %56 : vector<8x256xf32> to vector<8x256xbf16>
    %cst_27 = arith.constant dense<0.000000e+00> : vector<8x128xf32>
    %58 = tpu.matmul %57, %13, %cst_27 {dimension_numbers = #tpu.dot_dimension_numbers<[1], [0], [0], [1], [0, 0, 1, 1], [], []>} : vector<8x256xbf16>, vector<256x128xbf16>, vector<8x128xf32> -> vector<8x128xf32>
    %59 = vector.broadcast %14 : vector<1x128xf32> to vector<8x128xf32>
    %60 = arith.addf %58, %59 : vector<8x128xf32>
    %c3 = arith.constant 3 : index
    %c0_28 = arith.constant 0 : index
    %c0_29 = arith.constant 0 : index
    %61 = vector.load %arg8[%c3, %c0_28, %c0_29] : memref<8x8x128xf32, #tpu.memory_space<vmem>>, vector<1x8x128xf32>
    %62 = vector.shape_cast %61 : vector<1x8x128xf32> to vector<8x128xf32>
    %63 = vector.shape_cast %60 : vector<8x128xf32> to vector<1x8x128xf32>
    tpu.vector_store %arg8[%c3, %c0_28, %c0_29], %63 {strides = array<i32>} : memref<8x8x128xf32, #tpu.memory_space<vmem>>, vector<1x8x128xf32>,
    %64 = vector.extract_strided_slice %11 {offsets = [32, 0], sizes = [8, 256], strides = [1, 1]} : vector<64x256xf32> to vector<8x256xf32>
    %65 = arith.truncf %56 : vector<8x256xf32> to vector<8x256xbf16>
    %cst_30 = arith.constant dense<0.000000e+00> : vector<8x256xf32>
    %66 = tpu.matmul %65, %12, %cst_30 {dimension_numbers = #tpu.dot_dimension_numbers<[1], [0], [0], [1], [0, 0, 1, 1], [], []>} : vector<8x256xbf16>, vector<256x256xbf16>, vector<8x256xf32> -> vector<8x256xf32>
    %67 = arith.addf %64, %66 : vector<8x256xf32>
    %68 = math.tanh %67 : vector<8x256xf32>
    %69 = arith.truncf %68 : vector<8x256xf32> to vector<8x256xbf16>
    %cst_31 = arith.constant dense<0.000000e+00> : vector<8x128xf32>
    %70 = tpu.matmul %69, %13, %cst_31 {dimension_numbers = #tpu.dot_dimension_numbers<[1], [0], [0], [1], [0, 0, 1, 1], [], []>} : vector<8x256xbf16>, vector<256x128xbf16>, vector<8x128xf32> -> vector<8x128xf32>
    %71 = vector.broadcast %14 : vector<1x128xf32> to vector<8x128xf32>
    %72 = arith.addf %70, %71 : vector<8x128xf32>
    %c4 = arith.constant 4 : index
    %c0_32 = arith.constant 0 : index
    %c0_33 = arith.constant 0 : index
    %73 = vector.load %arg8[%c4, %c0_32, %c0_33] : memref<8x8x128xf32, #tpu.memory_space<vmem>>, vector<1x8x128xf32>
    %74 = vector.shape_cast %73 : vector<1x8x128xf32> to vector<8x128xf32>
    %75 = vector.shape_cast %72 : vector<8x128xf32> to vector<1x8x128xf32>
    tpu.vector_store %arg8[%c4, %c0_32, %c0_33], %75 {strides = array<i32>} : memref<8x8x128xf32, #tpu.memory_space<vmem>>, vector<1x8x128xf32>,
    %76 = vector.extract_strided_slice %11 {offsets = [40, 0], sizes = [8, 256], strides = [1, 1]} : vector<64x256xf32> to vector<8x256xf32>
    %77 = arith.truncf %68 : vector<8x256xf32> to vector<8x256xbf16>
    %cst_34 = arith.constant dense<0.000000e+00> : vector<8x256xf32>
    %78 = tpu.matmul %77, %12, %cst_34 {dimension_numbers = #tpu.dot_dimension_numbers<[1], [0], [0], [1], [0, 0, 1, 1], [], []>} : vector<8x256xbf16>, vector<256x256xbf16>, vector<8x256xf32> -> vector<8x256xf32>
    %79 = arith.addf %76, %78 : vector<8x256xf32>
    %80 = math.tanh %79 : vector<8x256xf32>
    %81 = arith.truncf %80 : vector<8x256xf32> to vector<8x256xbf16>
    %cst_35 = arith.constant dense<0.000000e+00> : vector<8x128xf32>
    %82 = tpu.matmul %81, %13, %cst_35 {dimension_numbers = #tpu.dot_dimension_numbers<[1], [0], [0], [1], [0, 0, 1, 1], [], []>} : vector<8x256xbf16>, vector<256x128xbf16>, vector<8x128xf32> -> vector<8x128xf32>
    %83 = vector.broadcast %14 : vector<1x128xf32> to vector<8x128xf32>
    %84 = arith.addf %82, %83 : vector<8x128xf32>
    %c5 = arith.constant 5 : index
    %c0_36 = arith.constant 0 : index
    %c0_37 = arith.constant 0 : index
    %85 = vector.load %arg8[%c5, %c0_36, %c0_37] : memref<8x8x128xf32, #tpu.memory_space<vmem>>, vector<1x8x128xf32>
    %86 = vector.shape_cast %85 : vector<1x8x128xf32> to vector<8x128xf32>
    %87 = vector.shape_cast %84 : vector<8x128xf32> to vector<1x8x128xf32>
    tpu.vector_store %arg8[%c5, %c0_36, %c0_37], %87 {strides = array<i32>} : memref<8x8x128xf32, #tpu.memory_space<vmem>>, vector<1x8x128xf32>,
    %88 = vector.extract_strided_slice %11 {offsets = [48, 0], sizes = [8, 256], strides = [1, 1]} : vector<64x256xf32> to vector<8x256xf32>
    %89 = arith.truncf %80 : vector<8x256xf32> to vector<8x256xbf16>
    %cst_38 = arith.constant dense<0.000000e+00> : vector<8x256xf32>
    %90 = tpu.matmul %89, %12, %cst_38 {dimension_numbers = #tpu.dot_dimension_numbers<[1], [0], [0], [1], [0, 0, 1, 1], [], []>} : vector<8x256xbf16>, vector<256x256xbf16>, vector<8x256xf32> -> vector<8x256xf32>
    %91 = arith.addf %88, %90 : vector<8x256xf32>
    %92 = math.tanh %91 : vector<8x256xf32>
    %93 = arith.truncf %92 : vector<8x256xf32> to vector<8x256xbf16>
    %cst_39 = arith.constant dense<0.000000e+00> : vector<8x128xf32>
    %94 = tpu.matmul %93, %13, %cst_39 {dimension_numbers = #tpu.dot_dimension_numbers<[1], [0], [0], [1], [0, 0, 1, 1], [], []>} : vector<8x256xbf16>, vector<256x128xbf16>, vector<8x128xf32> -> vector<8x128xf32>
    %95 = vector.broadcast %14 : vector<1x128xf32> to vector<8x128xf32>
    %96 = arith.addf %94, %95 : vector<8x128xf32>
    %c6 = arith.constant 6 : index
    %c0_40 = arith.constant 0 : index
    %c0_41 = arith.constant 0 : index
    %97 = vector.load %arg8[%c6, %c0_40, %c0_41] : memref<8x8x128xf32, #tpu.memory_space<vmem>>, vector<1x8x128xf32>
    %98 = vector.shape_cast %97 : vector<1x8x128xf32> to vector<8x128xf32>
    %99 = vector.shape_cast %96 : vector<8x128xf32> to vector<1x8x128xf32>
    tpu.vector_store %arg8[%c6, %c0_40, %c0_41], %99 {strides = array<i32>} : memref<8x8x128xf32, #tpu.memory_space<vmem>>, vector<1x8x128xf32>,
    %100 = vector.extract_strided_slice %11 {offsets = [56, 0], sizes = [8, 256], strides = [1, 1]} : vector<64x256xf32> to vector<8x256xf32>
    %101 = arith.truncf %92 : vector<8x256xf32> to vector<8x256xbf16>
    %cst_42 = arith.constant dense<0.000000e+00> : vector<8x256xf32>
    %102 = tpu.matmul %101, %12, %cst_42 {dimension_numbers = #tpu.dot_dimension_numbers<[1], [0], [0], [1], [0, 0, 1, 1], [], []>} : vector<8x256xbf16>, vector<256x256xbf16>, vector<8x256xf32> -> vector<8x256xf32>
    %103 = arith.addf %100, %102 : vector<8x256xf32>
    %104 = math.tanh %103 : vector<8x256xf32>
    %105 = arith.truncf %104 : vector<8x256xf32> to vector<8x256xbf16>
    %cst_43 = arith.constant dense<0.000000e+00> : vector<8x128xf32>
    %106 = tpu.matmul %105, %13, %cst_43 {dimension_numbers = #tpu.dot_dimension_numbers<[1], [0], [0], [1], [0, 0, 1, 1], [], []>} : vector<8x256xbf16>, vector<256x128xbf16>, vector<8x128xf32> -> vector<8x128xf32>
    %107 = vector.broadcast %14 : vector<1x128xf32> to vector<8x128xf32>
    %108 = arith.addf %106, %107 : vector<8x128xf32>
    %c7 = arith.constant 7 : index
    %c0_44 = arith.constant 0 : index
    %c0_45 = arith.constant 0 : index
    %109 = vector.load %arg8[%c7, %c0_44, %c0_45] : memref<8x8x128xf32, #tpu.memory_space<vmem>>, vector<1x8x128xf32>
    %110 = vector.shape_cast %109 : vector<1x8x128xf32> to vector<8x128xf32>
    %111 = vector.shape_cast %108 : vector<8x128xf32> to vector<1x8x128xf32>
    tpu.vector_store %arg8[%c7, %c0_44, %c0_45], %111 {strides = array<i32>} : memref<8x8x128xf32, #tpu.memory_space<vmem>>, vector<1x8x128xf32>,
    %c0_46 = arith.constant 0 : index
    %c0_47 = arith.constant 0 : index
    %112 = vector.load %arg9[%c0_46, %c0_47] : memref<8x256xf32, #tpu.memory_space<vmem>>, vector<8x256xf32>
    tpu.vector_store %arg9[%c0_46, %c0_47], %104 {strides = array<i32>} : memref<8x256xf32, #tpu.memory_space<vmem>>, vector<8x256xf32>,
    return
  }
  func.func @transform_0(%arg0: i32) -> (i32, i32) {
    %c0_i32 = arith.constant 0 : i32
    %c0_i32_0 = arith.constant 0 : i32
    %c0_i32_1 = arith.constant 0 : i32
    return %c0_i32, %c0_i32_0 : i32, i32
  }
  func.func @transform_1(%arg0: i32) -> (i32, i32) {
    %c0_i32 = arith.constant 0 : i32
    %c0_i32_0 = arith.constant 0 : i32
    %c0_i32_1 = arith.constant 0 : i32
    return %c0_i32, %c0_i32_0 : i32, i32
  }
  func.func @transform_2(%arg0: i32) -> (i32, i32) {
    %c0_i32 = arith.constant 0 : i32
    %c0_i32_0 = arith.constant 0 : i32
    %c0_i32_1 = arith.constant 0 : i32
    return %c0_i32, %c0_i32_0 : i32, i32
  }
  func.func @transform_3(%arg0: i32) -> (i32, i32) {
    %c0_i32 = arith.constant 0 : i32
    %c0_i32_0 = arith.constant 0 : i32
    %c0_i32_1 = arith.constant 0 : i32
    return %c0_i32, %c0_i32_0 : i32, i32
  }
  func.func @transform_4(%arg0: i32) -> (i32, i32) {
    %c0_i32 = arith.constant 0 : i32
    %c0_i32_0 = arith.constant 0 : i32
    %c0_i32_1 = arith.constant 0 : i32
    return %c0_i32, %c0_i32_0 : i32, i32
  }
  func.func @transform_5(%arg0: i32) -> (i32, i32) {
    %c0_i32 = arith.constant 0 : i32
    %c0_i32_0 = arith.constant 0 : i32
    %c0_i32_1 = arith.constant 0 : i32
    return %c0_i32, %c0_i32_0 : i32, i32
  }
  func.func @transform_6(%arg0: i32) -> (i32, i32) {
    %c0_i32 = arith.constant 0 : i32
    %c0_i32_0 = arith.constant 0 : i32
    %c0_i32_1 = arith.constant 0 : i32
    return %c0_i32, %c0_i32_0 : i32, i32
  }
  func.func @transform_7(%arg0: i32) -> (i32, i32, i32) {
    %c0_i32 = arith.constant 0 : i32
    %c0_i32_0 = arith.constant 0 : i32
    %c0_i32_1 = arith.constant 0 : i32
    %c0_i32_2 = arith.constant 0 : i32
    return %c0_i32, %c0_i32_0, %c0_i32_1 : i32, i32, i32
  }
  func.func @transform_8(%arg0: i32) -> (i32, i32) {
    %c0_i32 = arith.constant 0 : i32
    %c0_i32_0 = arith.constant 0 : i32
    %c0_i32_1 = arith.constant 0 : i32
    return %c0_i32, %c0_i32_0 : i32, i32
  }
}

</mosaic_0001>

<bundles_post_ra>
// kernel: text_generator_forward.1
= control target key start
LH: loop header
LB: loop body
LE: loop exit
PB: predicated region body
PF: predicated region fallthrough
CT: control target
= control target key end

     0   :  { %v1750_v0 = vmov 0   ;;  %s2767_s0 = inlined_call_operand.vmem [shape: s32[64,1], index: 0, kind: input, shape index: {}]   ;;  %s2768_s2 = inlined_call_operand.vmem [shape: bf16[256,256], index: 2, kind: input, shape index: {}]   ;;  %s2769_s1 = inlined_call_operand.vmem [shape: bf16[128,256], index: 1, kind: input, shape index: {}]   ;;  %s2770_s4 = inlined_call_operand.vmem [shape: f32[8,256], index: 4, kind: input, shape index: {}]   ;;  %s2771_s5 = inlined_call_operand.vmem [shape: bf16[256,128], index: 5, kind: input, shape index: {}]   ;;  %s2772_s3 = inlined_call_operand.vmem [shape: f32[1,256], index: 3, kind: input, shape index: {}]   ;;  %s2773_s6 = inlined_call_operand.vmem [shape: f32[1,128], index: 6, kind: input, shape index: {}]   ;;  %s2774_s7 = inlined_call_operand.vmem [shape: f32[8,8,128], index: 7, kind: output, shape index: {0}]   ;;  %s2775_s8 = inlined_call_operand.vmem [shape: f32[8,256], index: 8, kind: output, shape index: {1}]  }
   0x1   :  { %1591 = vset.pattern.permute.xlu1 %v1750_v0  ;;  %1590 = vset.pattern.permute.xlu0 %v1750_v0  ;;  %v31_v1 = vld [vmem:[%s2767_s0 + $0x10] sm:$0xff]  ;;  %v29_v2 = vld [vmem:[%s2767_s0] sm:$0xff]  ;;  %v32_v3 = vld [vmem:[%s2767_s0 + $0x18] sm:$0xff] }
   0x2   :  { %46 = vperm.xlu1 %1591, %v31_v1   ;;  %40 = vperm.xlu0 %1590, %v29_v2   ;;  %v30_v4 = vld [vmem:[%s2767_s0 + $0x8] sm:$0xff]  ;;  %v1825_v7 = vld [vmem:[%s2768_s2 + $0x14] ss:$8 sps:$4 sm:$0xff]   ;;  %v33_v9 = vld [vmem:[%s2767_s0 + $0x20] sm:$0xff] }
   0x3   :  { %231 = vmatprep.mubr.bf16.mxu0 %v1750_v0  ;;  %v1815_v5 = vld [vmem:[%s2768_s2 + $0x4] ss:$8 sps:$4 sm:$0xff]   ;;  %v1820_v6 = vld [vmem:[%s2768_s2] ss:$8 sps:$4 sm:$0xff]   ;;  %v1838_v10 = vld [vmem:[%s2768_s2 + $0x10] ss:$8 sps:$4 sm:$0xff]  }
   0x4   :  { %2784 = vst [vmem:[#allocation2_spill] sm:$0xff] %v1815_v5  ;;  %v34_v8 = vld [vmem:[%s2767_s0 + $0x28] sm:$0xff]  ;;  %501 = vmatprep.subr.bf16.mxu1 %v1815_v5  ;;  %v36_v12 = vld [vmem:[%s2767_s0 + $0x38] sm:$0xff]  ;;  %v35_v13 = vld [vmem:[%s2767_s0 + $0x30] sm:$0xff] }
   0x5   :  { %502 = vmatpush1.bf16.msra.mxu1 %v1820_v6  ;;  %v1844_v11 = vld [vmem:[%s2768_s2 + $0x24] ss:$8 sps:$4 sm:$0xff]   ;;  %v1856_v14 = vld [vmem:[%s2768_s2 + $0x20] ss:$8 sps:$4 sm:$0xff]   ;;  %v1862_v15 = vld [vmem:[%s2768_s2 + $0x34] ss:$8 sps:$4 sm:$0xff]  }
   0x6   :  { %49 = vperm.xlu1 %1591, %v32_v3   ;;  %43 = vperm.xlu0 %1590, %v30_v4   ;;  %v1868_v16 = vld [vmem:[%s2768_s2 + $0x30] ss:$8 sps:$4 sm:$0xff]   ;;  %v1618_v17 = vld [vmem:[%s2769_s1 + $0x4] ss:$8 sps:$4 sm:$0xff]   ;;  %v1621_v18 = vld [vmem:[%s2769_s1] ss:$8 sps:$4 sm:$0xff]   ;;  %v37_v4 = vlaneseq }
   0x7   :  { %503 = vmatprep.subr.bf16.mxu1 %v1825_v7  ;;  %v1880_v19 = vld [vmem:[%s2768_s2 + $0x44] ss:$8 sps:$4 sm:$0xff]   ;;  %199 = vmatprep.subr.bf16.mxu0 %v1618_v17  ;;  %v1624_v20 = vld [vmem:[%s2769_s1 + $0x14] ss:$8 sps:$4 sm:$0xff]   ;;  %v1627_v21 = vld [vmem:[%s2769_s1 + $0x10] ss:$8 sps:$4 sm:$0xff]  }
   0x8   :  { %200 = vmatpush1.bf16.msra.mxu0 %v1621_v18  ;;  %v1892_v22 = vld [vmem:[%s2768_s2 + $0x40] ss:$8 sps:$4 sm:$0xff]   ;;  %v1898_v23 = vld [vmem:[%s2768_s2 + $0x54] ss:$8 sps:$4 sm:$0xff]   ;;  %v1630_v24 = vld [vmem:[%s2769_s1 + $0x24] ss:$8 sps:$4 sm:$0xff]  }
   0x9   :  { %504 = vmatpush1.bf16.msra.mxu1 %v1838_v10  ;;  %201 = vmatprep.subr.bf16.mxu0 %v1624_v20  ;;  %v1633_v25 = vld [vmem:[%s2769_s1 + $0x20] ss:$8 sps:$4 sm:$0xff]   ;;  %v1910_v26 = vld [vmem:[%s2768_s2 + $0x50] ss:$8 sps:$4 sm:$0xff]   ;;  %v1636_v27 = vld [vmem:[%s2769_s1 + $0x34] ss:$8 sps:$4 sm:$0xff]  }
   0xa   :  { %55 = vperm.xlu1 %1591, %v34_v8   ;;  %52 = vperm.xlu0 %1590, %v33_v9   ;;  %v1919_v28 = vld [vmem:[%s2768_s2 + $0x64] ss:$8 sps:$4 sm:$0xff]   ;;  %v1924_v29 = vld [vmem:[%s2768_s2 + $0x60] ss:$8 sps:$4 sm:$0xff]   ;;  %v1639_v30 = vld [vmem:[%s2769_s1 + $0x30] ss:$8 sps:$4 sm:$0xff]  }
   0xb   :  { %505 = vmatprep.subr.bf16.mxu1 %v1844_v11  ;;  %v1642_v31 = vld [vmem:[%s2769_s1 + $0x44] ss:$8 sps:$4 sm:$0xff]   ;;  %v1937_v32 = vld [vmem:[%s2768_s2 + $0x74] ss:$8 sps:$4 sm:$0xff]   ;;  %v1645_v33 = vld [vmem:[%s2769_s1 + $0x40] ss:$8 sps:$4 sm:$0xff]  }
   0xc   :  { %202 = vmatpush1.bf16.msra.mxu0 %v1627_v21  ;;  %v1946_v34 = vld [vmem:[%s2768_s2 + $0x70] ss:$8 sps:$4 sm:$0xff]   ;;  %v1648_v35 = vld [vmem:[%s2769_s1 + $0x54] ss:$8 sps:$4 sm:$0xff]   ;;  %v1955_v36 = vld [vmem:[%s2768_s2 + $0x84] ss:$8 sps:$4 sm:$0xff]  }
   0xd   :  { %506 = vmatpush1.bf16.msra.mxu1 %v1856_v14  ;;  %203 = vmatprep.subr.bf16.mxu0 %v1630_v24  ;;  %v1960_v37 = vld [vmem:[%s2768_s2 + $0x80] ss:$8 sps:$4 sm:$0xff]   ;;  %v1651_v38 = vld [vmem:[%s2769_s1 + $0x50] ss:$8 sps:$4 sm:$0xff]   ;;  %v1654_v39 = vld [vmem:[%s2769_s1 + $0x64] ss:$8 sps:$4 sm:$0xff]  }
   0xe   :  { %61 = vperm.xlu1 %1591, %v36_v12   ;;  %58 = vperm.xlu0 %1590, %v35_v13   ;;  %v338_v40 = vld [vmem:[%s2770_s4 + $0x8] sm:$0xff]  ;;  %v1976_v41 = vld [vmem:[%s2768_s2 + $0x94] ss:$8 sps:$4 sm:$0xff]   ;;  %v1981_v43 = vld [vmem:[%s2768_s2 + $0x90] ss:$8 sps:$4 sm:$0xff]   ;;  %v38_v9 = vand.u32 127, %v37_v4 }
   0xf   :  { %507 = vmatprep.subr.bf16.mxu1 %v1862_v15  ;;  %v340_v42 = vpack.c.bf16 %v338_v40, %v338_v40  ;;  %v1986_v44 = vld [vmem:[%s2768_s2 + $0xa4] ss:$8 sps:$4 sm:$0xff]   ;;  %v1657_v45 = vld [vmem:[%s2769_s1 + $0x60] ss:$8 sps:$4 sm:$0xff]   ;;  %v1660_v46 = vld [vmem:[%s2769_s1 + $0x74] ss:$8 sps:$4 sm:$0xff]  }
  0x10   :  { %204 = vmatpush1.bf16.msra.mxu0 %v1633_v25  ;;  %v1663_v47 = vld [vmem:[%s2769_s1 + $0x70] ss:$8 sps:$4 sm:$0xff]   ;;  %v2002_v48 = vld [vmem:[%s2768_s2 + $0xa0] ss:$8 sps:$4 sm:$0xff]   ;;  %v2012_v50 = vld [vmem:[%s2768_s2 + $0xb4] ss:$8 sps:$4 sm:$0xff]  }
  0x11   :  { %508 = vmatpush1.bf16.msra.mxu1 %v1868_v16  ;;  %205 = vmatprep.subr.bf16.mxu0 %v1636_v27  ;;  %v2007_v49 = vld [vmem:[%s2771_s5 + $0x40] sm:$0xff]   ;;  %v2019_v51 = vld [vmem:[%s2768_s2 + $0xb0] ss:$8 sps:$4 sm:$0xff]   ;;  %v2039_v54 = vld [vmem:[%s2768_s2 + $0xd4] ss:$8 sps:$4 sm:$0xff]  }
  0x12   :  { %509 = vmatprep.subr.bf16.mxu1 %v1880_v19  ;;  %533 = vmatprep.mubr.bf16.mxu1 %v340_v42  ;;  %v2027_v52 = vld [vmem:[%s2768_s2 + $0xc4] ss:$8 sps:$4 sm:$0xff]   ;;  %v2033_v53 = vld [vmem:[%s2768_s2 + $0xc0] ss:$8 sps:$4 sm:$0xff]   ;;  %v2045_v55 = vld [vmem:[%s2768_s2 + $0xd0] ss:$8 sps:$4 sm:$0xff]  }
  0x13   :  { %v2051_v56 = vld [vmem:[%s2768_s2 + $0xe4] ss:$8 sps:$4 sm:$0xff]   ;;  %v2057_v57 = vld [vmem:[%s2768_s2 + $0xe0] ss:$8 sps:$4 sm:$0xff]   ;;  %v2063_v58 = vld [vmem:[%s2768_s2 + $0xf4] ss:$8 sps:$4 sm:$0xff]  }
  0x14   :  { %206 = vmatpush1.bf16.msra.mxu0 %v1639_v30  ;;  %v2069_v59 = vld [vmem:[%s2768_s2 + $0xf0] ss:$8 sps:$4 sm:$0xff]   ;;  %v337_v60 = vld [vmem:[%s2770_s4] sm:$0xff]  ;;  %v2085_v63 = vld [vmem:[%s2771_s5 + $0x48] sm:$0xff]   ;;  %v1751_v17 = vmov 1.0|1.0  }
  0x15   :  { %510 = vmatpush1.bf16.msra.mxu1 %v1892_v22  ;;  %207 = vmatprep.subr.bf16.mxu0 %v1642_v31  ;;  %v339_v61 = vpack.c.bf16 %v337_v60, %v337_v60  ;;  %v2080_v62 = vld [vmem:[%s2771_s5] sm:$0xff]   ;;  %v2092_v1 = vld [vmem:[%s2771_s5 + $0x8] sm:$0xff]   ;;  %v2097_v2 = vld [vmem:[%s2771_s5 + $0x50] sm:$0xff]  }
  0x16   :  { %511 = vmatprep.subr.bf16.mxu1 %v1898_v23  ;;  %v2104_v3 = vld [vmem:[%s2771_s5 + $0x10] sm:$0xff]   ;;  %v2119_v27 = vld [vmem:[%s2771_s5 + $0x58] sm:$0xff]   ;;  %v2138_v31 = vld [vmem:[%s2771_s5 + $0x20] sm:$0xff]  }
  0x17   :  { %v2126_v30 = vld [vmem:[%s2771_s5 + $0x18] sm:$0xff]  }
  0x18   :  { %208 = vmatpush1.bf16.msra.mxu0 %v1645_v33  ;;  %v2147_v33 = vld [vmem:[%s2771_s5 + $0x68] sm:$0xff]   ;;  %v2175_v40 = vld [vmem:[%s2771_s5 + $0x78] sm:$0xff]  }
  0x19   :  { %512 = vmatpush1.bf16.msra.mxu1 %v1910_v26  ;;  %209 = vmatprep.subr.bf16.mxu0 %v1648_v35  ;;  %v2152_v35 = vld [vmem:[%s2771_s5 + $0x28] sm:$0xff]   ;;  %2786 = vst [vmem:[#allocation4_spill] sm:$0xff] %v2175_v40  ;;  %v2180_v42 = vld [vmem:[%s2771_s5 + $0x38] sm:$0xff]  }
  0x1a   :  { %513 = vmatprep.subr.bf16.mxu1 %v1919_v28  ;;  %2787 = vst [vmem:[#allocation5_spill] sm:$0xff] %v2180_v42 }
  0x1c   :  { %210 = vmatpush1.bf16.msra.mxu0 %v1651_v38  ;;  %v2161_v38 = vld [vmem:[%s2771_s5 + $0x70] sm:$0xff]  }
  0x1d   :  { %514 = vmatpush1.bf16.msra.mxu1 %v1924_v29  ;;  %211 = vmatprep.subr.bf16.mxu0 %v1654_v39  ;;  %v2166_v39 = vld [vmem:[%s2771_s5 + $0x30] sm:$0xff]  }
  0x1e   :  { %515 = vmatprep.subr.bf16.mxu1 %v1937_v32  ;;  %2785 = vst [vmem:[#allocation3_spill] sm:$0xff] %v2166_v39 }
  0x20   :  { %212 = vmatpush1.bf16.msra.mxu0 %v1657_v45 }
  0x21   :  { %516 = vmatpush1.bf16.msra.mxu1 %v1946_v34  ;;  %213 = vmatprep.subr.bf16.mxu0 %v1660_v46 }
  0x22   :  { %517 = vmatprep.subr.bf16.mxu1 %v1955_v36 }
  0x24   :  { %214 = vmatpush1.bf16.msra.mxu0 %v1663_v47 }
  0x25   :  { %518 = vmatpush1.bf16.msra.mxu1 %v1960_v37  ;;  %1412 = vmatprep.subr.bf16.mxu0 %v2007_v49 }
  0x26   :  { %519 = vmatprep.subr.bf16.mxu1 %v1976_v41 }
  0x29   :  { %520 = vmatpush1.bf16.msra.mxu1 %v1981_v43 }
  0x2a   :  { %521 = vmatprep.subr.bf16.mxu1 %v1986_v44 }
  0x2d   :  { %522 = vmatpush1.bf16.msra.mxu1 %v2002_v48 }
  0x2e   :  { %523 = vmatprep.subr.bf16.mxu1 %v2012_v50 }
  0x31   :  { %524 = vmatpush1.bf16.msra.mxu1 %v2019_v51 }
  0x32   :  { %525 = vmatprep.subr.bf16.mxu1 %v2027_v52 }
  0x35   :  { %526 = vmatpush1.bf16.msra.mxu1 %v2033_v53 }
  0x36   :  { %527 = vmatprep.subr.bf16.mxu1 %v2039_v54 }
  0x39   :  { %528 = vmatpush1.bf16.msra.mxu1 %v2045_v55 }
  0x3a   :  { %529 = vmatprep.subr.bf16.mxu1 %v2051_v56 }
  0x3d   :  { %530 = vmatpush1.bf16.msra.mxu1 %v2057_v57 }
  0x3e   :  { %531 = vmatprep.subr.bf16.mxu1 %v2063_v58 }
  0x41   :  { %532 = vmatpush1.bf16.msra.mxu1 %v2069_v59 }
  0x42   :  { %1434 = vmatprep.subr.bf16.mxu1 %v2007_v49 }
  0x44   :  { %534 = vmatmul.mubr.bf16.vlgmr.msra.gmra.mrb[0].mxu1 %v339_v61  ;;  %v110_v61 = vshrl.u32 %v37_v4, 7 }
  0x45   :  { %1435 = vmatpush3.bf16.msra.mxu1 %v2080_v62 }
  0x46   :  { %1436 = vmatprep.subr.bf16.mxu1 %v2085_v63 }
  0x49   :  { %1437 = vmatpush3.bf16.msra.mxu1 %v2092_v1 }
  0x4a   :  { %1438 = vmatprep.subr.bf16.mxu1 %v2097_v2 }
  0x4d   :  { %1439 = vmatpush3.bf16.msra.mxu1 %v2104_v3 }
  0x4e   :  { %1440 = vmatprep.subr.bf16.mxu1 %v2119_v27 }
  0x51   :  { %1441 = vmatpush3.bf16.msra.mxu1 %v2126_v30 }
  0x81   :  { %v41_v8 = vpop.permute.xlu0 %40  ;;  %v47_v12 = vpop.permute.xlu1 %46 }
  0x82   :  { %vm63_vm1 = vcmp.eq.s32.totalorder %v38_v9, %v41_v8  ;;  %vm65_vm3 = vcmp.eq.s32.totalorder %v38_v9, %v47_v12  ;;  %v111_v8 = vsub.s32 0, %v110_v61  ;;  %v115_v12 = vsub.s32 1, %v110_v61 }
  0x85   :  { %v44_v13 = vpop.permute.xlu0 %43  ;;  %v50_v18 = vpop.permute.xlu1 %49 }
  0x86   :  { %vm64_vm0 = vcmp.eq.s32.totalorder %v38_v9, %v44_v13  ;;  %vm66_vm4 = vcmp.eq.s32.totalorder %v38_v9, %v50_v18 }
  0x87   :  { %vm1348_vm2 = vmpackc.low %vm64_vm0, %vm63_vm1 }
  0x88   :  { %1349 = vmatmul.mubr.msk.bf16.vlgmr.msra.gmra.mrb[0].mxu0 %vm1348_vm2, %v1751_v17  ;;  %vm1350_vm5 = vmpackc.low %vm66_vm4, %vm65_vm3 }
  0x89   :  { %241 = vmatprep.mubr.bf16.mxu0 %v1750_v0  ;;  %1413 = vmatpush3.bf16.msra.mxu0 %v2080_v62  ;;  %v56_v20 = vpop.permute.xlu1 %55  ;;  %v53_v21 = vpop.permute.xlu0 %52 }
  0x8a   :  { %1414 = vmatprep.subr.bf16.mxu0 %v2085_v63  ;;  %vm68_vm6 = vcmp.eq.s32.totalorder %v38_v9, %v56_v20  ;;  %vm67_vm7 = vcmp.eq.s32.totalorder %v38_v9, %v53_v21 }
  0x8b   :  { %vm1352_vm8 = vmpackc.low %vm68_vm6, %vm67_vm7 }
  0x8d   :  { %1415 = vmatpush3.bf16.msra.mxu0 %v2092_v1  ;;  %v62_v24 = vpop.permute.xlu1 %61  ;;  %v59_v25 = vpop.permute.xlu0 %58 }
  0x8e   :  { %1416 = vmatprep.subr.bf16.mxu0 %v2097_v2  ;;  %vm70_vm9 = vcmp.eq.s32.totalorder %v38_v9, %v62_v24  ;;  %vm69_vm10 = vcmp.eq.s32.totalorder %v38_v9, %v59_v25  ;;  %v107_v9 = vld [vmem:[%s2772_s3] sm:$0x3] }
  0x8f   :  { %vm1354_vm11 = vmpackc.low %vm70_vm9, %vm69_vm10  ;;  %v112_v13 = vrot.slane %v107_v9, %v111_v8 }
  0x90   :  { %1351 = vmatmul.mubr.msk.bf16.gmra.mrb[4].mxu0 %vm1350_vm5, %v1751_v17 }
  0x91   :  { %251 = vmatprep.mubr.bf16.mxu0 %v1750_v0  ;;  %1417 = vmatpush3.bf16.msra.mxu0 %v2104_v3 }
  0x92   :  { %1418 = vmatprep.subr.bf16.mxu0 %v2119_v27 }
  0x95   :  { %1419 = vmatpush3.bf16.msra.mxu0 %v2126_v30 }
  0x98   :  { %1353 = vmatmul.mubr.msk.bf16.gmra.mrb[8].mxu0 %vm1352_vm8, %v1751_v17 }
  0x99   :  { %261 = vmatprep.mubr.bf16.mxu0 %v1750_v0  ;;  %v2133_v0 = vld [vmem:[%s2771_s5 + $0x60] sm:$0xff]  }
  0x9a   :  { %1420 = vmatprep.subr.bf16.mxu0 %v2133_v0  ;;  %1442 = vmatprep.subr.bf16.mxu1 %v2133_v0 }
  0x9b   :  { %1421 = vmatpush3.bf16.msra.mxu0 %v2138_v31  ;;  %1443 = vmatpush3.bf16.msra.mxu1 %v2138_v31 }
  0x9c   :  { %1422 = vmatprep.subr.bf16.mxu0 %v2147_v33  ;;  %1444 = vmatprep.subr.bf16.mxu1 %v2147_v33 }
  0x9f   :  { %1423 = vmatpush3.bf16.msra.mxu0 %v2152_v35  ;;  %1445 = vmatpush3.bf16.msra.mxu1 %v2152_v35 }
  0xa0   :  { %1355 = vmatmul.mubr.msk.bf16.gmra.mrb[12].mxu0 %vm1354_vm11, %v1751_v17  ;;  %1424 = vmatprep.subr.bf16.mxu0 %v2161_v38  ;;  %v116_v17 = vrot.slane %v107_v9, %v115_v12 }
  0xa1   :  { %1446 = vmatprep.subr.bf16.mxu1 %v2161_v38 }
  0xa3   :  { %1425 = vmatpush3.bf16.msra.mxu0 %v2166_v39  ;;  %1447 = vmatpush3.bf16.msra.mxu1 %v2166_v39 }
  0xa4   :  { %1426 = vmatprep.subr.bf16.mxu0 %v2175_v40  ;;  %1448 = vmatprep.subr.bf16.mxu1 %v2175_v40 }
  0xa7   :  { %1427 = vmatpush3.bf16.msra.mxu0 %v2180_v42  ;;  %1449 = vmatpush3.bf16.msra.mxu1 %v2180_v42 }
  0xa8   :  { %691 = vmatprep.subr.bf16.mxu0 %v1815_v5  ;;  %780 = vmatprep.subr.bf16.mxu1 %v1815_v5 }
 0x117   :  { %v535_v45 = vpop.f32.mrb[0].mxu1 }
 0x118   :  { %v537_v46 = vpop.f32.mrb[1].mxu1 }
 0x119   :  { %v539_v47 = vpop.f32.mrb[2].mxu1 }
 0x11a   :  { %v540_v60 = vpop.f32.mrb[3].mxu1 }
 0x15b   :  { %v233_v18 = vpop.f32.mrb[0].mxu0 }
 0x15c   :  { %v234_v20 = vadd.f32 %v233_v18, %v112_v13  ;;  %v235_v21 = vpop.f32.mrb[1].mxu0 }
 0x15d   :  { %v236_v24 = vadd.f32 %v235_v21, %v116_v17  ;;  %v237_v25 = vpop.f32.mrb[2].mxu0 }
 0x15e   :  { %v542_v5 = vadd.f32 %v535_v45, %v234_v20  ;;  %v2192_v42 = vadd.f32 %v237_v25, %v112_v13  ;;  %v239_v47 = vpop.f32.mrb[3].mxu0 }
 0x15f   :  { %v543_v60 = vadd.f32 %v537_v46, %v236_v24  ;;  %v2194_v40 = vadd.f32 %v239_v47, %v116_v17 }
 0x160   :  { %1680 = vtanh.f32 %v542_v5 }
 0x161   :  { %1682 = vtanh.f32 %v543_v60 }
 0x163   :  { %v243_v4 = vpop.f32.mrb[4].mxu0 }
 0x164   :  { %v2196_v39 = vadd.f32 %v243_v4, %v112_v13  ;;  %v245_v61 = vpop.f32.mrb[5].mxu0 }
 0x165   :  { %v2198_v8 = vadd.f32 %v245_v61, %v116_v17  ;;  %v247_v9 = vpop.f32.mrb[6].mxu0 }
 0x166   :  { %2788 = vst [vmem:[#allocation6_spill] sm:$0xff] %v2196_v39  ;;  %v2200_v12 = vadd.f32 %v247_v9, %v112_v13  ;;  %v249_v18 = vpop.f32.mrb[7].mxu0 }
 0x167   :  { %2789 = vst [vmem:[#allocation7_spill] sm:$0xff] %v2198_v8  ;;  %v2202_v21 = vadd.f32 %v249_v18, %v116_v17 }
 0x168   :  { %2790 = vst [vmem:[#allocation8_spill] sm:$0xff] %v2200_v12 }
 0x169   :  { %2791 = vst [vmem:[#allocation9_spill] sm:$0xff] %v2202_v21 }
 0x16a   :  { %v1681_v45 = vpop.eup %1680 }
 0x16b   :  { %v1683_v20 = vpop.eup %1682  ;;  %v253_v25 = vpop.f32.mrb[8].mxu0  ;;  %v546_v47 = vpack.c.bf16 %v1681_v45, %v1681_v45 }
 0x16c   :  { %v2204_v46 = vadd.f32 %v253_v25, %v112_v13  ;;  %v255_v24 = vpop.f32.mrb[9].mxu0  ;;  %v547_v5 = vpack.c.bf16 %v1683_v20, %v1683_v20 }
 0x16d   :  { %v2206_v60 = vadd.f32 %v255_v24, %v116_v17  ;;  %v257_v4 = vpop.f32.mrb[10].mxu0 }
 0x16e   :  { %2792 = vst [vmem:[#allocation10_spill] sm:$0xff] %v2204_v46  ;;  %v2208_v39 = vadd.f32 %v257_v4, %v112_v13  ;;  %v259_v61 = vpop.f32.mrb[11].mxu0  ;;  %682 = vmatprep.mubr.bf16.mxu0 %v547_v5 }
 0x16f   :  { %2793 = vst [vmem:[#allocation11_spill] sm:$0xff] %v2206_v60  ;;  %v2210_v9 = vadd.f32 %v259_v61, %v116_v17  ;;  %683 = vmatmul.mubr.bf16.vlgmr.msra.gmra.mrb[16].mxu0 %v546_v47 }
 0x170   :  { %2794 = vst [vmem:[#allocation12_spill] sm:$0xff] %v2208_v39  ;;  %692 = vmatpush1.bf16.msra.mxu0 %v1820_v6  ;;  %723 = vmatprep.mubr.bf16.mxu0 %v547_v5  ;;  %v2802_v5 = vld [vmem:[#allocation5_spill] sm:$0xff] }
 0x171   :  { %2795 = vst [vmem:[#allocation13_spill] sm:$0xff] %v2210_v9  ;;  %693 = vmatprep.subr.bf16.mxu0 %v1825_v7 }
 0x173   :  { %v263_v18 = vpop.f32.mrb[12].mxu0 }
 0x174   :  { %v2214_v25 = vadd.f32 %v263_v18, %v112_v13  ;;  %694 = vmatpush1.bf16.msra.mxu0 %v1838_v10  ;;  %v265_v45 = vpop.f32.mrb[13].mxu0 }
 0x175   :  { %v2217_v20 = vadd.f32 %v265_v45, %v116_v17  ;;  %v267_v24 = vpop.f32.mrb[14].mxu0  ;;  %695 = vmatprep.subr.bf16.mxu0 %v1844_v11  ;;  %v2271_v45 = vld [vmem:[%s2773_s6] ss:$0 sm:$0xff] }
 0x176   :  { %2796 = vst [vmem:[#allocation14_spill] sm:$0xff] %v2214_v25  ;;  %v2220_v4 = vadd.f32 %v267_v24, %v112_v13  ;;  %v269_v61 = vpop.f32.mrb[15].mxu0  ;;  %v2800_v13 = vld [vmem:[#allocation3_spill] sm:$0xff] }
 0x177   :  { %2797 = vst [vmem:[#allocation15_spill] sm:$0xff] %v2217_v20  ;;  %v2222_v9 = vadd.f32 %v269_v61, %v116_v17  ;;  %v2801_v17 = vld [vmem:[#allocation4_spill] sm:$0xff] }
 0x178   :  { %2798 = vst [vmem:[#allocation16_spill] sm:$0xff] %v2220_v4  ;;  %696 = vmatpush1.bf16.msra.mxu0 %v1856_v14 }
 0x179   :  { %2799 = vst [vmem:[#allocation17_spill] sm:$0xff] %v2222_v9  ;;  %697 = vmatprep.subr.bf16.mxu0 %v1862_v15 }
 0x17c   :  { %698 = vmatpush1.bf16.msra.mxu0 %v1868_v16 }
 0x17d   :  { %699 = vmatprep.subr.bf16.mxu0 %v1880_v19 }
 0x180   :  { %700 = vmatpush1.bf16.msra.mxu0 %v1892_v22 }
 0x181   :  { %701 = vmatprep.subr.bf16.mxu0 %v1898_v23 }
 0x184   :  { %702 = vmatpush1.bf16.msra.mxu0 %v1910_v26 }
 0x185   :  { %703 = vmatprep.subr.bf16.mxu0 %v1919_v28 }
 0x188   :  { %704 = vmatpush1.bf16.msra.mxu0 %v1924_v29 }
 0x189   :  { %705 = vmatprep.subr.bf16.mxu0 %v1937_v32 }
 0x18c   :  { %706 = vmatpush1.bf16.msra.mxu0 %v1946_v34 }
 0x18d   :  { %707 = vmatprep.subr.bf16.mxu0 %v1955_v36 }
 0x190   :  { %708 = vmatpush1.bf16.msra.mxu0 %v1960_v37 }
 0x191   :  { %709 = vmatprep.subr.bf16.mxu0 %v1976_v41 }
 0x194   :  { %710 = vmatpush1.bf16.msra.mxu0 %v1981_v43 }
 0x195   :  { %711 = vmatprep.subr.bf16.mxu0 %v1986_v44 }
 0x198   :  { %712 = vmatpush1.bf16.msra.mxu0 %v2002_v48 }
 0x199   :  { %713 = vmatprep.subr.bf16.mxu0 %v2012_v50 }
 0x19c   :  { %714 = vmatpush1.bf16.msra.mxu0 %v2019_v51 }
 0x19d   :  { %715 = vmatprep.subr.bf16.mxu0 %v2027_v52 }
 0x1a0   :  { %716 = vmatpush1.bf16.msra.mxu0 %v2033_v53 }
 0x1a1   :  { %717 = vmatprep.subr.bf16.mxu0 %v2039_v54 }
 0x1a4   :  { %718 = vmatpush1.bf16.msra.mxu0 %v2045_v55 }
 0x1a5   :  { %719 = vmatprep.subr.bf16.mxu0 %v2051_v56 }
 0x1a8   :  { %720 = vmatpush1.bf16.msra.mxu0 %v2057_v57 }
 0x1a9   :  { %721 = vmatprep.subr.bf16.mxu0 %v2063_v58 }
 0x1ac   :  { %722 = vmatpush1.bf16.msra.mxu0 %v2069_v59 }
 0x1ad   :  { %1456 = vmatprep.subr.bf16.mxu0 %v2007_v49 }
 0x1af   :  { %724 = vmatmul.mubr.bf16.vlgmr.msra.gmra.mrb[20].mxu0 %v546_v47  ;;  %v2803_v47 = vld [vmem:[#allocation2_spill] sm:$0xff] }
 0x1b0   :  { %1457 = vmatpush3.bf16.msra.mxu0 %v2080_v62 }
 0x1b1   :  { %1458 = vmatprep.subr.bf16.mxu0 %v2085_v63 }
 0x1b4   :  { %1459 = vmatpush3.bf16.msra.mxu0 %v2092_v1 }
 0x1b5   :  { %1460 = vmatprep.subr.bf16.mxu0 %v2097_v2 }
 0x1b8   :  { %1461 = vmatpush3.bf16.msra.mxu0 %v2104_v3 }
 0x1b9   :  { %1462 = vmatprep.subr.bf16.mxu0 %v2119_v27 }
 0x1bc   :  { %1463 = vmatpush3.bf16.msra.mxu0 %v2126_v30 }
 0x1bd   :  { %1464 = vmatprep.subr.bf16.mxu0 %v2133_v0 }
 0x1c0   :  { %1465 = vmatpush3.bf16.msra.mxu0 %v2138_v31 }
 0x1c1   :  { %1466 = vmatprep.subr.bf16.mxu0 %v2147_v33 }
 0x1c4   :  { %1467 = vmatpush3.bf16.msra.mxu0 %v2152_v35 }
 0x1c5   :  { %1468 = vmatprep.subr.bf16.mxu0 %v2161_v38 }
 0x1c8   :  { %1469 = vmatpush3.bf16.msra.mxu0 %v2800_v13 }
 0x1c9   :  { %1470 = vmatprep.subr.bf16.mxu0 %v2801_v17 }
 0x1cc   :  { %1471 = vmatpush3.bf16.msra.mxu0 %v2802_v5 }
 0x1cd   :  { %869 = vmatprep.subr.bf16.mxu0 %v2803_v47 }
 0x242   :  { %v1428_v18 = vpop.f32.mrb[16].mxu0 }
 0x243   :  { %v1429_v24 = vpop.f32.mrb[17].mxu0 }
 0x244   :  { %v1430_v61 = vadd.f32 %v1429_v24, %v1428_v18  ;;  %v1431_v9 = vpop.f32.mrb[18].mxu0  ;;  %v2805_v24 = vld [vmem:[#allocation7_spill] sm:$0xff] }
 0x245   :  { %v1432_v4 = vpop.f32.mrb[19].mxu0 }
 0x246   :  { %v685_v20 = vadd.f32 %v1430_v61, %v2271_v45 }
 0x248   :  { %690 = vst [vmem:[%s2774_s7] sm:$0xff] %v685_v20 }
 0x282   :  { %v725_v25 = vpop.f32.mrb[20].mxu0 }
 0x283   :  { %v732_v39 = vadd.f32 %v725_v25, %v2192_v42  ;;  %v727_v60 = vpop.f32.mrb[21].mxu0 }
 0x284   :  { %v733_v46 = vadd.f32 %v727_v60, %v2194_v40  ;;  %v729_v21 = vpop.f32.mrb[22].mxu0  ;;  %v2804_v60 = vld [vmem:[#allocation6_spill] sm:$0xff] }
 0x285   :  { %1684 = vtanh.f32 %v732_v39  ;;  %v730_v12 = vpop.f32.mrb[23].mxu0 }
 0x286   :  { %1686 = vtanh.f32 %v733_v46 }
 0x28f   :  { %v1685_v8 = vpop.eup %1684 }
 0x290   :  { %v1687_v18 = vpop.eup %1686  ;;  %v736_v4 = vpack.c.bf16 %v1685_v8, %v1685_v8 }
 0x291   :  { %v737_v9 = vpack.c.bf16 %v1687_v18, %v1687_v18 }
 0x293   :  { %770 = vmatprep.mubr.bf16.mxu1 %v737_v9 }
 0x294   :  { %771 = vmatmul.mubr.bf16.vlgmr.msra.gmra.mrb[4].mxu1 %v736_v4 }
 0x295   :  { %781 = vmatpush1.bf16.msra.mxu1 %v1820_v6  ;;  %812 = vmatprep.mubr.bf16.mxu1 %v737_v9 }
 0x296   :  { %782 = vmatprep.subr.bf16.mxu1 %v1825_v7 }
 0x299   :  { %783 = vmatpush1.bf16.msra.mxu1 %v1838_v10 }
 0x29a   :  { %784 = vmatprep.subr.bf16.mxu1 %v1844_v11 }
 0x29d   :  { %785 = vmatpush1.bf16.msra.mxu1 %v1856_v14 }
 0x29e   :  { %786 = vmatprep.subr.bf16.mxu1 %v1862_v15 }
 0x2a1   :  { %787 = vmatpush1.bf16.msra.mxu1 %v1868_v16 }
 0x2a2   :  { %788 = vmatprep.subr.bf16.mxu1 %v1880_v19 }
 0x2a5   :  { %789 = vmatpush1.bf16.msra.mxu1 %v1892_v22 }
 0x2a6   :  { %790 = vmatprep.subr.bf16.mxu1 %v1898_v23 }
 0x2a9   :  { %791 = vmatpush1.bf16.msra.mxu1 %v1910_v26 }
 0x2aa   :  { %792 = vmatprep.subr.bf16.mxu1 %v1919_v28 }
 0x2ad   :  { %793 = vmatpush1.bf16.msra.mxu1 %v1924_v29 }
 0x2ae   :  { %794 = vmatprep.subr.bf16.mxu1 %v1937_v32 }
 0x2b1   :  { %795 = vmatpush1.bf16.msra.mxu1 %v1946_v34 }
 0x2b2   :  { %796 = vmatprep.subr.bf16.mxu1 %v1955_v36 }
 0x2b5   :  { %797 = vmatpush1.bf16.msra.mxu1 %v1960_v37 }
 0x2b6   :  { %798 = vmatprep.subr.bf16.mxu1 %v1976_v41 }
 0x2b9   :  { %799 = vmatpush1.bf16.msra.mxu1 %v1981_v43 }
 0x2ba   :  { %800 = vmatprep.subr.bf16.mxu1 %v1986_v44 }
 0x2bd   :  { %801 = vmatpush1.bf16.msra.mxu1 %v2002_v48 }
 0x2be   :  { %802 = vmatprep.subr.bf16.mxu1 %v2012_v50 }
 0x2c1   :  { %803 = vmatpush1.bf16.msra.mxu1 %v2019_v51 }
 0x2c2   :  { %804 = vmatprep.subr.bf16.mxu1 %v2027_v52 }
 0x2c5   :  { %805 = vmatpush1.bf16.msra.mxu1 %v2033_v53 }
 0x2c6   :  { %806 = vmatprep.subr.bf16.mxu1 %v2039_v54 }
 0x2c9   :  { %807 = vmatpush1.bf16.msra.mxu1 %v2045_v55 }
 0x2ca   :  { %808 = vmatprep.subr.bf16.mxu1 %v2051_v56 }
 0x2cd   :  { %809 = vmatpush1.bf16.msra.mxu1 %v2057_v57 }
 0x2ce   :  { %810 = vmatprep.subr.bf16.mxu1 %v2063_v58 }
 0x2d1   :  { %811 = vmatpush1.bf16.msra.mxu1 %v2069_v59 }
 0x2d2   :  { %1478 = vmatprep.subr.bf16.mxu1 %v2007_v49 }
 0x2d4   :  { %813 = vmatmul.mubr.bf16.vlgmr.msra.gmra.mrb[8].mxu1 %v736_v4 }
 0x2d5   :  { %1479 = vmatpush3.bf16.msra.mxu1 %v2080_v62 }
 0x2d6   :  { %1480 = vmatprep.subr.bf16.mxu1 %v2085_v63 }
 0x2d9   :  { %1481 = vmatpush3.bf16.msra.mxu1 %v2092_v1 }
 0x2da   :  { %1482 = vmatprep.subr.bf16.mxu1 %v2097_v2 }
 0x2dd   :  { %1483 = vmatpush3.bf16.msra.mxu1 %v2104_v3 }
 0x2de   :  { %1484 = vmatprep.subr.bf16.mxu1 %v2119_v27 }
 0x2e1   :  { %1485 = vmatpush3.bf16.msra.mxu1 %v2126_v30 }
 0x2e2   :  { %1486 = vmatprep.subr.bf16.mxu1 %v2133_v0 }
 0x2e5   :  { %1487 = vmatpush3.bf16.msra.mxu1 %v2138_v31 }
 0x2e6   :  { %1488 = vmatprep.subr.bf16.mxu1 %v2147_v33 }
 0x2e9   :  { %1489 = vmatpush3.bf16.msra.mxu1 %v2152_v35 }
 0x2ea   :  { %1490 = vmatprep.subr.bf16.mxu1 %v2161_v38 }
 0x2ed   :  { %1491 = vmatpush3.bf16.msra.mxu1 %v2800_v13 }
 0x2ee   :  { %1492 = vmatprep.subr.bf16.mxu1 %v2801_v17 }
 0x2f1   :  { %1493 = vmatpush3.bf16.msra.mxu1 %v2802_v5 }
 0x2f2   :  { %958 = vmatprep.subr.bf16.mxu1 %v2803_v47 }
 0x367   :  { %v1450_v39 = vpop.f32.mrb[4].mxu1 }
 0x368   :  { %v1451_v40 = vpop.f32.mrb[5].mxu1 }
 0x369   :  { %v1452_v42 = vadd.f32 %v1451_v40, %v1450_v39  ;;  %v1453_v8 = vpop.f32.mrb[6].mxu1 }
 0x36a   :  { %v1454_v12 = vpop.f32.mrb[7].mxu1 }
 0x36b   :  { %v773_v21 = vadd.f32 %v1452_v42, %v2271_v45  ;;  %v2806_v12 = vld [vmem:[#allocation8_spill] sm:$0xff] }
 0x36d   :  { %1405 = vst [vmem:[%s2774_s7 + $0x8] sm:$0xff] %v773_v21 }
 0x3a7   :  { %v814_v46 = vpop.f32.mrb[8].mxu1 }
 0x3a8   :  { %v821_v25 = vadd.f32 %v814_v46, %v2804_v60  ;;  %v816_v20 = vpop.f32.mrb[9].mxu1  ;;  %v2807_v60 = vld [vmem:[#allocation9_spill] sm:$0xff] }
 0x3a9   :  { %v822_v61 = vadd.f32 %v816_v20, %v2805_v24  ;;  %v818_v18 = vpop.f32.mrb[10].mxu1 }
 0x3aa   :  { %1688 = vtanh.f32 %v821_v25  ;;  %v819_v47 = vpop.f32.mrb[11].mxu1 }
 0x3ab   :  { %1690 = vtanh.f32 %v822_v61 }
 0x3b4   :  { %v1689_v9 = vpop.eup %1688 }
 0x3b5   :  { %v1691_v4 = vpop.eup %1690  ;;  %v825_v40 = vpack.c.bf16 %v1689_v9, %v1689_v9 }
 0x3b6   :  { %v826_v39 = vpack.c.bf16 %v1691_v4, %v1691_v4  ;;  %v2395_v4 = vld [vmem:[%s2768_s2] ss:$8 sps:$4 sm:$0xff]  }
 0x3b8   :  { %859 = vmatprep.mubr.bf16.mxu0 %v826_v39 }
 0x3b9   :  { %860 = vmatmul.mubr.bf16.vlgmr.msra.gmra.mrb[24].mxu0 %v825_v40 }
 0x3ba   :  { %870 = vmatpush1.bf16.msra.mxu0 %v1820_v6  ;;  %901 = vmatprep.mubr.bf16.mxu0 %v826_v39  ;;  %v2383_v6 = vld [vmem:[%s2768_s2 + $0x4] ss:$8 sps:$4 sm:$0xff]   ;;  %v2401_v39 = vld [vmem:[%s2768_s2 + $0x14] ss:$8 sps:$4 sm:$0xff]  }
 0x3bb   :  { %871 = vmatprep.subr.bf16.mxu0 %v1825_v7 }
 0x3be   :  { %872 = vmatpush1.bf16.msra.mxu0 %v1838_v10 }
 0x3bf   :  { %873 = vmatprep.subr.bf16.mxu0 %v1844_v11 }
 0x3c2   :  { %874 = vmatpush1.bf16.msra.mxu0 %v1856_v14 }
 0x3c3   :  { %875 = vmatprep.subr.bf16.mxu0 %v1862_v15 }
 0x3c6   :  { %876 = vmatpush1.bf16.msra.mxu0 %v1868_v16 }
 0x3c7   :  { %877 = vmatprep.subr.bf16.mxu0 %v1880_v19 }
 0x3ca   :  { %878 = vmatpush1.bf16.msra.mxu0 %v1892_v22 }
 0x3cb   :  { %879 = vmatprep.subr.bf16.mxu0 %v1898_v23 }
 0x3ce   :  { %880 = vmatpush1.bf16.msra.mxu0 %v1910_v26 }
 0x3cf   :  { %881 = vmatprep.subr.bf16.mxu0 %v1919_v28 }
 0x3d2   :  { %882 = vmatpush1.bf16.msra.mxu0 %v1924_v29 }
 0x3d3   :  { %883 = vmatprep.subr.bf16.mxu0 %v1937_v32 }
 0x3d6   :  { %884 = vmatpush1.bf16.msra.mxu0 %v1946_v34 }
 0x3d7   :  { %885 = vmatprep.subr.bf16.mxu0 %v1955_v36 }
 0x3da   :  { %886 = vmatpush1.bf16.msra.mxu0 %v1960_v37 }
 0x3db   :  { %887 = vmatprep.subr.bf16.mxu0 %v1976_v41 }
 0x3de   :  { %888 = vmatpush1.bf16.msra.mxu0 %v1981_v43 }
 0x3df   :  { %889 = vmatprep.subr.bf16.mxu0 %v1986_v44 }
 0x3e2   :  { %890 = vmatpush1.bf16.msra.mxu0 %v2002_v48 }
 0x3e3   :  { %891 = vmatprep.subr.bf16.mxu0 %v2012_v50 }
 0x3e6   :  { %892 = vmatpush1.bf16.msra.mxu0 %v2019_v51 }
 0x3e7   :  { %893 = vmatprep.subr.bf16.mxu0 %v2027_v52 }
 0x3ea   :  { %894 = vmatpush1.bf16.msra.mxu0 %v2033_v53 }
 0x3eb   :  { %895 = vmatprep.subr.bf16.mxu0 %v2039_v54 }
 0x3ee   :  { %896 = vmatpush1.bf16.msra.mxu0 %v2045_v55 }
 0x3ef   :  { %897 = vmatprep.subr.bf16.mxu0 %v2051_v56 }
 0x3f2   :  { %898 = vmatpush1.bf16.msra.mxu0 %v2057_v57 }
 0x3f3   :  { %899 = vmatprep.subr.bf16.mxu0 %v2063_v58 }
 0x3f6   :  { %900 = vmatpush1.bf16.msra.mxu0 %v2069_v59 }
 0x3f7   :  { %1500 = vmatprep.subr.bf16.mxu0 %v2007_v49 }
 0x3f9   :  { %902 = vmatmul.mubr.bf16.vlgmr.msra.gmra.mrb[28].mxu0 %v825_v40  ;;  %v2407_v40 = vld [vmem:[%s2768_s2 + $0x10] ss:$8 sps:$4 sm:$0xff]  }
 0x3fa   :  { %1501 = vmatpush3.bf16.msra.mxu0 %v2080_v62 }
 0x3fb   :  { %1502 = vmatprep.subr.bf16.mxu0 %v2085_v63 }
 0x3fe   :  { %1503 = vmatpush3.bf16.msra.mxu0 %v2092_v1 }
 0x3ff   :  { %1504 = vmatprep.subr.bf16.mxu0 %v2097_v2 }
 0x402   :  { %1505 = vmatpush3.bf16.msra.mxu0 %v2104_v3 }
 0x403   :  { %1506 = vmatprep.subr.bf16.mxu0 %v2119_v27 }
 0x406   :  { %1507 = vmatpush3.bf16.msra.mxu0 %v2126_v30 }
 0x407   :  { %1508 = vmatprep.subr.bf16.mxu0 %v2133_v0 }
 0x40a   :  { %1509 = vmatpush3.bf16.msra.mxu0 %v2138_v31 }
 0x40b   :  { %1510 = vmatprep.subr.bf16.mxu0 %v2147_v33 }
 0x40e   :  { %1511 = vmatpush3.bf16.msra.mxu0 %v2152_v35 }
 0x40f   :  { %1512 = vmatprep.subr.bf16.mxu0 %v2161_v38 }
 0x412   :  { %1513 = vmatpush3.bf16.msra.mxu0 %v2800_v13 }
 0x413   :  { %1514 = vmatprep.subr.bf16.mxu0 %v2801_v17 }
 0x416   :  { %1515 = vmatpush3.bf16.msra.mxu0 %v2802_v5 }
 0x417   :  { %1047 = vmatprep.subr.bf16.mxu0 %v2383_v6 }
 0x48c   :  { %v1472_v7 = vpop.f32.mrb[24].mxu0 }
 0x48d   :  { %v1473_v10 = vpop.f32.mrb[25].mxu0 }
 0x48e   :  { %v1474_v11 = vadd.f32 %v1473_v10, %v1472_v7  ;;  %v1475_v14 = vpop.f32.mrb[26].mxu0  ;;  %v2413_v7 = vld [vmem:[%s2768_s2 + $0x24] ss:$8 sps:$4 sm:$0xff]   ;;  %v2419_v10 = vld [vmem:[%s2768_s2 + $0x20] ss:$8 sps:$4 sm:$0xff]  }
 0x48f   :  { %v1476_v15 = vpop.f32.mrb[27].mxu0 }
 0x490   :  { %v862_v42 = vadd.f32 %v1474_v11, %v2271_v45  ;;  %v2425_v11 = vld [vmem:[%s2768_s2 + $0x34] ss:$8 sps:$4 sm:$0xff]  }
 0x492   :  { %1406 = vst [vmem:[%s2774_s7 + $0x10] sm:$0xff] %v862_v42 }
 0x4cc   :  { %v903_v8 = vpop.f32.mrb[28].mxu0 }
 0x4cd   :  { %v910_v21 = vadd.f32 %v903_v8, %v2806_v12  ;;  %v905_v46 = vpop.f32.mrb[29].mxu0 }
 0x4ce   :  { %v911_v25 = vadd.f32 %v905_v46, %v2807_v60  ;;  %v907_v20 = vpop.f32.mrb[30].mxu0  ;;  %v2485_v60 = vld [vmem:[%s2768_s2 + $0x30] ss:$8 sps:$4 sm:$0xff]  }
 0x4cf   :  { %1692 = vtanh.f32 %v910_v21  ;;  %v908_v24 = vpop.f32.mrb[31].mxu0  ;;  %v2497_v20 = vld [vmem:[%s2768_s2 + $0x40] ss:$8 sps:$4 sm:$0xff]  }
 0x4d0   :  { %1694 = vtanh.f32 %v911_v25  ;;  %v2491_v25 = vld [vmem:[%s2768_s2 + $0x44] ss:$8 sps:$4 sm:$0xff]   ;;  %v2503_v24 = vld [vmem:[%s2768_s2 + $0x54] ss:$8 sps:$4 sm:$0xff]  }
 0x4d9   :  { %v1693_v61 = vpop.eup %1692 }
 0x4da   :  { %v1695_v18 = vpop.eup %1694  ;;  %v914_v9 = vpack.c.bf16 %v1693_v61, %v1693_v61  ;;  %v2509_v61 = vld [vmem:[%s2768_s2 + $0x50] ss:$8 sps:$4 sm:$0xff]  }
 0x4db   :  { %v915_v47 = vpack.c.bf16 %v1695_v18, %v1695_v18  ;;  %v2515_v18 = vld [vmem:[%s2768_s2 + $0x64] ss:$8 sps:$4 sm:$0xff]  }
 0x4dd   :  { %948 = vmatprep.mubr.bf16.mxu1 %v915_v47 }
 0x4de   :  { %949 = vmatmul.mubr.bf16.vlgmr.msra.gmra.mrb[12].mxu1 %v914_v9 }
 0x4df   :  { %959 = vmatpush1.bf16.msra.mxu1 %v2395_v4  ;;  %990 = vmatprep.mubr.bf16.mxu1 %v915_v47  ;;  %v2521_v47 = vld [vmem:[%s2768_s2 + $0x60] ss:$8 sps:$4 sm:$0xff]  }
 0x4e0   :  { %960 = vmatprep.subr.bf16.mxu1 %v2401_v39 }
 0x4e3   :  { %961 = vmatpush1.bf16.msra.mxu1 %v2407_v40 }
 0x4e4   :  { %962 = vmatprep.subr.bf16.mxu1 %v2413_v7 }
 0x4e7   :  { %963 = vmatpush1.bf16.msra.mxu1 %v2419_v10 }
 0x4e8   :  { %964 = vmatprep.subr.bf16.mxu1 %v2425_v11 }
 0x4eb   :  { %965 = vmatpush1.bf16.msra.mxu1 %v1868_v16 }
 0x4ec   :  { %966 = vmatprep.subr.bf16.mxu1 %v1880_v19 }
 0x4ef   :  { %967 = vmatpush1.bf16.msra.mxu1 %v1892_v22 }
 0x4f0   :  { %968 = vmatprep.subr.bf16.mxu1 %v1898_v23 }
 0x4f3   :  { %969 = vmatpush1.bf16.msra.mxu1 %v1910_v26 }
 0x4f4   :  { %970 = vmatprep.subr.bf16.mxu1 %v1919_v28 }
 0x4f7   :  { %971 = vmatpush1.bf16.msra.mxu1 %v1924_v29 }
 0x4f8   :  { %972 = vmatprep.subr.bf16.mxu1 %v1937_v32  ;;  %v2808_v32 = vld [vmem:[#allocation10_spill] sm:$0xff] }
 0x4fb   :  { %973 = vmatpush1.bf16.msra.mxu1 %v1946_v34 }
 0x4fc   :  { %974 = vmatprep.subr.bf16.mxu1 %v1955_v36 }
 0x4ff   :  { %975 = vmatpush1.bf16.msra.mxu1 %v1960_v37  ;;  %v2809_v37 = vld [vmem:[#allocation11_spill] sm:$0xff] }
 0x500   :  { %976 = vmatprep.subr.bf16.mxu1 %v1976_v41 }
 0x503   :  { %977 = vmatpush1.bf16.msra.mxu1 %v1981_v43 }
 0x504   :  { %978 = vmatprep.subr.bf16.mxu1 %v1986_v44 }
 0x507   :  { %979 = vmatpush1.bf16.msra.mxu1 %v2002_v48 }
 0x508   :  { %980 = vmatprep.subr.bf16.mxu1 %v2012_v50 }
 0x50b   :  { %981 = vmatpush1.bf16.msra.mxu1 %v2019_v51 }
 0x50c   :  { %982 = vmatprep.subr.bf16.mxu1 %v2027_v52 }
 0x50f   :  { %983 = vmatpush1.bf16.msra.mxu1 %v2033_v53 }
 0x510   :  { %984 = vmatprep.subr.bf16.mxu1 %v2039_v54 }
 0x513   :  { %985 = vmatpush1.bf16.msra.mxu1 %v2045_v55 }
 0x514   :  { %986 = vmatprep.subr.bf16.mxu1 %v2051_v56 }
 0x517   :  { %987 = vmatpush1.bf16.msra.mxu1 %v2057_v57 }
 0x518   :  { %988 = vmatprep.subr.bf16.mxu1 %v2063_v58 }
 0x51b   :  { %989 = vmatpush1.bf16.msra.mxu1 %v2069_v59 }
 0x51c   :  { %1522 = vmatprep.subr.bf16.mxu1 %v2007_v49 }
 0x51e   :  { %991 = vmatmul.mubr.bf16.vlgmr.msra.gmra.mrb[16].mxu1 %v914_v9  ;;  %v2527_v9 = vld [vmem:[%s2768_s2 + $0x74] ss:$8 sps:$4 sm:$0xff]  }
 0x51f   :  { %1523 = vmatpush3.bf16.msra.mxu1 %v2080_v62 }
 0x520   :  { %1524 = vmatprep.subr.bf16.mxu1 %v2085_v63 }
 0x523   :  { %1525 = vmatpush3.bf16.msra.mxu1 %v2092_v1 }
 0x524   :  { %1526 = vmatprep.subr.bf16.mxu1 %v2097_v2 }
 0x527   :  { %1527 = vmatpush3.bf16.msra.mxu1 %v2104_v3 }
 0x528   :  { %1528 = vmatprep.subr.bf16.mxu1 %v2119_v27 }
 0x52b   :  { %1529 = vmatpush3.bf16.msra.mxu1 %v2126_v30 }
 0x52c   :  { %1530 = vmatprep.subr.bf16.mxu1 %v2133_v0 }
 0x52f   :  { %1531 = vmatpush3.bf16.msra.mxu1 %v2138_v31 }
 0x530   :  { %1532 = vmatprep.subr.bf16.mxu1 %v2147_v33 }
 0x533   :  { %1533 = vmatpush3.bf16.msra.mxu1 %v2152_v35 }
 0x534   :  { %1534 = vmatprep.subr.bf16.mxu1 %v2161_v38 }
 0x537   :  { %1535 = vmatpush3.bf16.msra.mxu1 %v2800_v13 }
 0x538   :  { %1536 = vmatprep.subr.bf16.mxu1 %v2801_v17 }
 0x53b   :  { %1537 = vmatpush3.bf16.msra.mxu1 %v2802_v5 }
 0x53c   :  { %1136 = vmatprep.subr.bf16.mxu1 %v2383_v6 }
 0x5b1   :  { %v1494_v16 = vpop.f32.mrb[12].mxu1 }
 0x5b2   :  { %v1495_v19 = vpop.f32.mrb[13].mxu1 }
 0x5b3   :  { %v1496_v22 = vadd.f32 %v1495_v19, %v1494_v16  ;;  %v1497_v23 = vpop.f32.mrb[14].mxu1  ;;  %v2533_v16 = vld [vmem:[%s2768_s2 + $0x70] ss:$8 sps:$4 sm:$0xff]   ;;  %v2539_v19 = vld [vmem:[%s2768_s2 + $0x84] ss:$8 sps:$4 sm:$0xff]  }
 0x5b4   :  { %v1498_v26 = vpop.f32.mrb[15].mxu1  ;;  %v2623_v23 = vld [vmem:[%s2768_s2 + $0xa0] ss:$8 sps:$4 sm:$0xff]  }
 0x5b5   :  { %v951_v28 = vadd.f32 %v1496_v22, %v2271_v45  ;;  %v2545_v22 = vld [vmem:[%s2768_s2 + $0x80] ss:$8 sps:$4 sm:$0xff]   ;;  %v2629_v26 = vld [vmem:[%s2768_s2 + $0xb4] ss:$8 sps:$4 sm:$0xff]  }
 0x5b7   :  { %1407 = vst [vmem:[%s2774_s7 + $0x18] sm:$0xff] %v951_v28  ;;  %v2635_v28 = vld [vmem:[%s2768_s2 + $0xb0] ss:$8 sps:$4 sm:$0xff]  }
 0x5f1   :  { %v992_v29 = vpop.f32.mrb[16].mxu1 }
 0x5f2   :  { %v999_v34 = vadd.f32 %v992_v29, %v2808_v32  ;;  %v994_v36 = vpop.f32.mrb[17].mxu1  ;;  %v2641_v29 = vld [vmem:[%s2768_s2 + $0xc4] ss:$8 sps:$4 sm:$0xff]   ;;  %v2647_v32 = vld [vmem:[%s2768_s2 + $0xc0] ss:$8 sps:$4 sm:$0xff]  }
 0x5f3   :  { %v1000_v14 = vadd.f32 %v994_v36, %v2809_v37  ;;  %v996_v15 = vpop.f32.mrb[18].mxu1  ;;  %v2659_v36 = vld [vmem:[%s2768_s2 + $0xd0] ss:$8 sps:$4 sm:$0xff]   ;;  %v2665_v37 = vld [vmem:[%s2768_s2 + $0xe4] ss:$8 sps:$4 sm:$0xff]  }
 0x5f4   :  { %1696 = vtanh.f32 %v999_v34  ;;  %v997_v42 = vpop.f32.mrb[19].mxu1  ;;  %v2653_v34 = vld [vmem:[%s2768_s2 + $0xd4] ss:$8 sps:$4 sm:$0xff]  }
 0x5f5   :  { %1698 = vtanh.f32 %v1000_v14  ;;  %v2671_v14 = vld [vmem:[%s2768_s2 + $0xe0] ss:$8 sps:$4 sm:$0xff]   ;;  %v2677_v15 = vld [vmem:[%s2768_s2 + $0xf4] ss:$8 sps:$4 sm:$0xff]   ;;  %v2683_v42 = vld [vmem:[%s2768_s2 + $0xf0] ss:$8 sps:$4 sm:$0xff]  }
 0x5fe   :  { %v1697_v8 = vpop.eup %1696 }
 0x5ff   :  { %v1699_v12 = vpop.eup %1698  ;;  %v1003_v46 = vpack.c.bf16 %v1697_v8, %v1697_v8  ;;  %v1744_v8 = vld [vmem:[%s2771_s5 + $0x40] sm:$0xff]  }
 0x600   :  { %v1004_v21 = vpack.c.bf16 %v1699_v12, %v1699_v12  ;;  %v1745_v12 = vld [vmem:[%s2771_s5] sm:$0xff]  }
 0x602   :  { %1037 = vmatprep.mubr.bf16.mxu0 %v1004_v21 }
 0x603   :  { %1038 = vmatmul.mubr.bf16.vlgmr.msra.gmra.mrb[32].mxu0 %v1003_v46 }
 0x604   :  { %1048 = vmatpush1.bf16.msra.mxu0 %v2395_v4  ;;  %1079 = vmatprep.mubr.bf16.mxu0 %v1004_v21  ;;  %v1746_v21 = vld [vmem:[%s2771_s5 + $0x48] sm:$0xff]  }
 0x605   :  { %1049 = vmatprep.subr.bf16.mxu0 %v2401_v39 }
 0x608   :  { %1050 = vmatpush1.bf16.msra.mxu0 %v2407_v40 }
 0x609   :  { %1051 = vmatprep.subr.bf16.mxu0 %v2413_v7 }
 0x60c   :  { %1052 = vmatpush1.bf16.msra.mxu0 %v2419_v10 }
 0x60d   :  { %1053 = vmatprep.subr.bf16.mxu0 %v2425_v11 }
 0x610   :  { %1054 = vmatpush1.bf16.msra.mxu0 %v2485_v60 }
 0x611   :  { %1055 = vmatprep.subr.bf16.mxu0 %v2491_v25 }
 0x614   :  { %1056 = vmatpush1.bf16.msra.mxu0 %v2497_v20 }
 0x615   :  { %1057 = vmatprep.subr.bf16.mxu0 %v2503_v24 }
 0x618   :  { %1058 = vmatpush1.bf16.msra.mxu0 %v2509_v61 }
 0x619   :  { %1059 = vmatprep.subr.bf16.mxu0 %v2515_v18 }
 0x61c   :  { %1060 = vmatpush1.bf16.msra.mxu0 %v2521_v47 }
 0x61d   :  { %1061 = vmatprep.subr.bf16.mxu0 %v2527_v9 }
 0x620   :  { %1062 = vmatpush1.bf16.msra.mxu0 %v2533_v16 }
 0x621   :  { %1063 = vmatprep.subr.bf16.mxu0 %v2539_v19 }
 0x624   :  { %1064 = vmatpush1.bf16.msra.mxu0 %v2545_v22 }
 0x625   :  { %1065 = vmatprep.subr.bf16.mxu0 %v1976_v41 }
 0x628   :  { %1066 = vmatpush1.bf16.msra.mxu0 %v1981_v43 }
 0x629   :  { %1067 = vmatprep.subr.bf16.mxu0 %v1986_v44 }
 0x62c   :  { %1068 = vmatpush1.bf16.msra.mxu0 %v2002_v48 }
 0x62d   :  { %1069 = vmatprep.subr.bf16.mxu0 %v2012_v50 }
 0x630   :  { %1070 = vmatpush1.bf16.msra.mxu0 %v2019_v51 }
 0x631   :  { %1071 = vmatprep.subr.bf16.mxu0 %v2027_v52  ;;  %v2810_v52 = vld [vmem:[#allocation12_spill] sm:$0xff] }
 0x634   :  { %1072 = vmatpush1.bf16.msra.mxu0 %v2033_v53 }
 0x635   :  { %1073 = vmatprep.subr.bf16.mxu0 %v2039_v54 }
 0x638   :  { %1074 = vmatpush1.bf16.msra.mxu0 %v2045_v55  ;;  %v2811_v55 = vld [vmem:[#allocation13_spill] sm:$0xff] }
 0x639   :  { %1075 = vmatprep.subr.bf16.mxu0 %v2051_v56 }
 0x63c   :  { %1076 = vmatpush1.bf16.msra.mxu0 %v2057_v57 }
 0x63d   :  { %1077 = vmatprep.subr.bf16.mxu0 %v2063_v58 }
 0x640   :  { %1078 = vmatpush1.bf16.msra.mxu0 %v2069_v59 }
 0x641   :  { %1544 = vmatprep.subr.bf16.mxu0 %v2007_v49 }
 0x643   :  { %1080 = vmatmul.mubr.bf16.vlgmr.msra.gmra.mrb[36].mxu0 %v1003_v46  ;;  %v1747_v46 = vld [vmem:[%s2771_s5 + $0x8] sm:$0xff]  }
 0x644   :  { %1545 = vmatpush3.bf16.msra.mxu0 %v2080_v62 }
 0x645   :  { %1546 = vmatprep.subr.bf16.mxu0 %v2085_v63 }
 0x648   :  { %1547 = vmatpush3.bf16.msra.mxu0 %v2092_v1 }
 0x649   :  { %1548 = vmatprep.subr.bf16.mxu0 %v2097_v2  ;;  %v2605_v2 = vld [vmem:[%s2768_s2 + $0x94] ss:$8 sps:$4 sm:$0xff]  }
 0x64c   :  { %1549 = vmatpush3.bf16.msra.mxu0 %v2104_v3  ;;  %v2611_v3 = vld [vmem:[%s2768_s2 + $0x90] ss:$8 sps:$4 sm:$0xff]  }
 0x64d   :  { %1550 = vmatprep.subr.bf16.mxu0 %v2119_v27 }
 0x650   :  { %1551 = vmatpush3.bf16.msra.mxu0 %v2126_v30 }
 0x651   :  { %1552 = vmatprep.subr.bf16.mxu0 %v2133_v0 }
 0x654   :  { %1553 = vmatpush3.bf16.msra.mxu0 %v2138_v31 }
 0x655   :  { %1554 = vmatprep.subr.bf16.mxu0 %v2147_v33 }
 0x658   :  { %1555 = vmatpush3.bf16.msra.mxu0 %v2152_v35 }
 0x659   :  { %1556 = vmatprep.subr.bf16.mxu0 %v2161_v38 }
 0x65c   :  { %1557 = vmatpush3.bf16.msra.mxu0 %v2800_v13 }
 0x65d   :  { %1558 = vmatprep.subr.bf16.mxu0 %v2801_v17 }
 0x660   :  { %1559 = vmatpush3.bf16.msra.mxu0 %v2802_v5 }
 0x661   :  { %1225 = vmatprep.subr.bf16.mxu0 %v2383_v6  ;;  %v2617_v6 = vld [vmem:[%s2768_s2 + $0xa4] ss:$8 sps:$4 sm:$0xff]  }
 0x6d6   :  { %v1516_v41 = vpop.f32.mrb[32].mxu0 }
 0x6d7   :  { %v1517_v43 = vpop.f32.mrb[33].mxu0 }
 0x6d8   :  { %v1518_v44 = vadd.f32 %v1517_v43, %v1516_v41  ;;  %v1519_v48 = vpop.f32.mrb[34].mxu0  ;;  %v1748_v41 = vld [vmem:[%s2771_s5 + $0x50] sm:$0xff]  }
 0x6d9   :  { %v1520_v49 = vpop.f32.mrb[35].mxu0  ;;  %v1749_v43 = vld [vmem:[%s2771_s5 + $0x10] sm:$0xff]  }
 0x6da   :  { %v1040_v50 = vadd.f32 %v1518_v44, %v2271_v45 }
 0x6dc   :  { %1408 = vst [vmem:[%s2774_s7 + $0x20] sm:$0xff] %v1040_v50 }
 0x716   :  { %v1081_v51 = vpop.f32.mrb[36].mxu0 }
 0x717   :  { %v1088_v53 = vadd.f32 %v1081_v51, %v2810_v52  ;;  %v1083_v54 = vpop.f32.mrb[37].mxu0 }
 0x718   :  { %v1089_v56 = vadd.f32 %v1083_v54, %v2811_v55  ;;  %v1085_v57 = vpop.f32.mrb[38].mxu0 }
 0x719   :  { %1700 = vtanh.f32 %v1088_v53  ;;  %v1086_v58 = vpop.f32.mrb[39].mxu0 }
 0x71a   :  { %1702 = vtanh.f32 %v1089_v56 }
 0x723   :  { %v1701_v59 = vpop.eup %1700 }
 0x724   :  { %v1703_v62 = vpop.eup %1702  ;;  %v1092_v1 = vpack.c.bf16 %v1701_v59, %v1701_v59 }
 0x725   :  { %v1093_v63 = vpack.c.bf16 %v1703_v62, %v1703_v62 }
 0x727   :  { %1126 = vmatprep.mubr.bf16.mxu1 %v1093_v63 }
 0x728   :  { %1127 = vmatmul.mubr.bf16.vlgmr.msra.gmra.mrb[20].mxu1 %v1092_v1 }
 0x729   :  { %1137 = vmatpush1.bf16.msra.mxu1 %v2395_v4  ;;  %1168 = vmatprep.mubr.bf16.mxu1 %v1093_v63 }
 0x72a   :  { %1138 = vmatprep.subr.bf16.mxu1 %v2401_v39 }
 0x72d   :  { %1139 = vmatpush1.bf16.msra.mxu1 %v2407_v40 }
 0x72e   :  { %1140 = vmatprep.subr.bf16.mxu1 %v2413_v7 }
 0x731   :  { %1141 = vmatpush1.bf16.msra.mxu1 %v2419_v10 }
 0x732   :  { %1142 = vmatprep.subr.bf16.mxu1 %v2425_v11 }
 0x735   :  { %1143 = vmatpush1.bf16.msra.mxu1 %v2485_v60 }
 0x736   :  { %1144 = vmatprep.subr.bf16.mxu1 %v2491_v25 }
 0x739   :  { %1145 = vmatpush1.bf16.msra.mxu1 %v2497_v20 }
 0x73a   :  { %1146 = vmatprep.subr.bf16.mxu1 %v2503_v24 }
 0x73d   :  { %1147 = vmatpush1.bf16.msra.mxu1 %v2509_v61 }
 0x73e   :  { %1148 = vmatprep.subr.bf16.mxu1 %v2515_v18 }
 0x741   :  { %1149 = vmatpush1.bf16.msra.mxu1 %v2521_v47 }
 0x742   :  { %1150 = vmatprep.subr.bf16.mxu1 %v2527_v9 }
 0x745   :  { %1151 = vmatpush1.bf16.msra.mxu1 %v2533_v16 }
 0x746   :  { %1152 = vmatprep.subr.bf16.mxu1 %v2539_v19 }
 0x749   :  { %1153 = vmatpush1.bf16.msra.mxu1 %v2545_v22 }
 0x74a   :  { %1154 = vmatprep.subr.bf16.mxu1 %v2605_v2 }
 0x74d   :  { %1155 = vmatpush1.bf16.msra.mxu1 %v2611_v3 }
 0x74e   :  { %1156 = vmatprep.subr.bf16.mxu1 %v2617_v6 }
 0x751   :  { %1157 = vmatpush1.bf16.msra.mxu1 %v2623_v23 }
 0x752   :  { %1158 = vmatprep.subr.bf16.mxu1 %v2629_v26 }
 0x755   :  { %1159 = vmatpush1.bf16.msra.mxu1 %v2635_v28 }
 0x756   :  { %1160 = vmatprep.subr.bf16.mxu1 %v2641_v29 }
 0x759   :  { %1161 = vmatpush1.bf16.msra.mxu1 %v2647_v32 }
 0x75a   :  { %1162 = vmatprep.subr.bf16.mxu1 %v2653_v34 }
 0x75d   :  { %1163 = vmatpush1.bf16.msra.mxu1 %v2659_v36 }
 0x75e   :  { %1164 = vmatprep.subr.bf16.mxu1 %v2665_v37 }
 0x761   :  { %1165 = vmatpush1.bf16.msra.mxu1 %v2671_v14 }
 0x762   :  { %1166 = vmatprep.subr.bf16.mxu1 %v2677_v15 }
 0x765   :  { %1167 = vmatpush1.bf16.msra.mxu1 %v2683_v42 }
 0x766   :  { %1566 = vmatprep.subr.bf16.mxu1 %v1744_v8 }
 0x768   :  { %1169 = vmatmul.mubr.bf16.vlgmr.msra.gmra.mrb[24].mxu1 %v1092_v1 }
 0x769   :  { %1567 = vmatpush3.bf16.msra.mxu1 %v1745_v12 }
 0x76a   :  { %1568 = vmatprep.subr.bf16.mxu1 %v1746_v21 }
 0x76d   :  { %1569 = vmatpush3.bf16.msra.mxu1 %v1747_v46 }
 0x76e   :  { %1570 = vmatprep.subr.bf16.mxu1 %v1748_v41 }
 0x771   :  { %1571 = vmatpush3.bf16.msra.mxu1 %v1749_v43 }
 0x772   :  { %1572 = vmatprep.subr.bf16.mxu1 %v2119_v27 }
 0x775   :  { %1573 = vmatpush3.bf16.msra.mxu1 %v2126_v30 }
 0x776   :  { %1574 = vmatprep.subr.bf16.mxu1 %v2133_v0 }
 0x779   :  { %1575 = vmatpush3.bf16.msra.mxu1 %v2138_v31 }
 0x77a   :  { %1576 = vmatprep.subr.bf16.mxu1 %v2147_v33  ;;  %v2812_v33 = vld [vmem:[#allocation14_spill] sm:$0xff] }
 0x77d   :  { %1577 = vmatpush3.bf16.msra.mxu1 %v2152_v35 }
 0x77e   :  { %1578 = vmatprep.subr.bf16.mxu1 %v2161_v38 }
 0x781   :  { %1579 = vmatpush3.bf16.msra.mxu1 %v2800_v13  ;;  %v2813_v13 = vld [vmem:[#allocation15_spill] sm:$0xff] }
 0x782   :  { %1580 = vmatprep.subr.bf16.mxu1 %v2801_v17 }
 0x785   :  { %1581 = vmatpush3.bf16.msra.mxu1 %v2802_v5 }
 0x7fb   :  { %v1538_v44 = vpop.f32.mrb[20].mxu1 }
 0x7fc   :  { %v1539_v27 = vpop.f32.mrb[21].mxu1 }
 0x7fd   :  { %v1540_v48 = vadd.f32 %v1539_v27, %v1538_v44  ;;  %v1541_v30 = vpop.f32.mrb[22].mxu1 }
 0x7fe   :  { %v1542_v49 = vpop.f32.mrb[23].mxu1 }
 0x7ff   :  { %v1129_v0 = vadd.f32 %v1540_v48, %v2271_v45 }
 0x801   :  { %1409 = vst [vmem:[%s2774_s7 + $0x28] sm:$0xff] %v1129_v0 }
 0x83b   :  { %v1170_v31 = vpop.f32.mrb[24].mxu1 }
 0x83c   :  { %v1177_v35 = vadd.f32 %v1170_v31, %v2812_v33  ;;  %v1172_v38 = vpop.f32.mrb[25].mxu1 }
 0x83d   :  { %v1178_v50 = vadd.f32 %v1172_v38, %v2813_v13  ;;  %v1174_v17 = vpop.f32.mrb[26].mxu1 }
 0x83e   :  { %1704 = vtanh.f32 %v1177_v35  ;;  %v1175_v5 = vpop.f32.mrb[27].mxu1 }
 0x83f   :  { %1706 = vtanh.f32 %v1178_v50 }
 0x848   :  { %v1705_v51 = vpop.eup %1704 }
 0x849   :  { %v1707_v52 = vpop.eup %1706  ;;  %v1181_v54 = vpack.c.bf16 %v1705_v51, %v1705_v51 }
 0x84a   :  { %v1182_v53 = vpack.c.bf16 %v1707_v52, %v1707_v52 }
 0x84c   :  { %1215 = vmatprep.mubr.bf16.mxu0 %v1182_v53 }
 0x84d   :  { %1216 = vmatmul.mubr.bf16.vlgmr.msra.gmra.mrb[40].mxu0 %v1181_v54 }
 0x84e   :  { %1226 = vmatpush1.bf16.msra.mxu0 %v2395_v4  ;;  %1257 = vmatprep.mubr.bf16.mxu0 %v1182_v53 }
 0x84f   :  { %1227 = vmatprep.subr.bf16.mxu0 %v2401_v39 }
 0x852   :  { %1228 = vmatpush1.bf16.msra.mxu0 %v2407_v40 }
 0x853   :  { %1229 = vmatprep.subr.bf16.mxu0 %v2413_v7 }
 0x856   :  { %1230 = vmatpush1.bf16.msra.mxu0 %v2419_v10 }
 0x857   :  { %1231 = vmatprep.subr.bf16.mxu0 %v2425_v11 }
 0x85a   :  { %1232 = vmatpush1.bf16.msra.mxu0 %v2485_v60 }
 0x85b   :  { %1233 = vmatprep.subr.bf16.mxu0 %v2491_v25  ;;  %v2814_v25 = vld [vmem:[#allocation16_spill] sm:$0xff] }
 0x85e   :  { %1234 = vmatpush1.bf16.msra.mxu0 %v2497_v20 }
 0x85f   :  { %1235 = vmatprep.subr.bf16.mxu0 %v2503_v24 }
 0x862   :  { %1236 = vmatpush1.bf16.msra.mxu0 %v2509_v61  ;;  %v2815_v61 = vld [vmem:[#allocation17_spill] sm:$0xff] }
 0x863   :  { %1237 = vmatprep.subr.bf16.mxu0 %v2515_v18 }
 0x866   :  { %1238 = vmatpush1.bf16.msra.mxu0 %v2521_v47 }
 0x867   :  { %1239 = vmatprep.subr.bf16.mxu0 %v2527_v9 }
 0x86a   :  { %1240 = vmatpush1.bf16.msra.mxu0 %v2533_v16 }
 0x86b   :  { %1241 = vmatprep.subr.bf16.mxu0 %v2539_v19 }
 0x86e   :  { %1242 = vmatpush1.bf16.msra.mxu0 %v2545_v22 }
 0x86f   :  { %1243 = vmatprep.subr.bf16.mxu0 %v2605_v2 }
 0x872   :  { %1244 = vmatpush1.bf16.msra.mxu0 %v2611_v3 }
 0x873   :  { %1245 = vmatprep.subr.bf16.mxu0 %v2617_v6 }
 0x876   :  { %1246 = vmatpush1.bf16.msra.mxu0 %v2623_v23 }
 0x877   :  { %1247 = vmatprep.subr.bf16.mxu0 %v2629_v26 }
 0x87a   :  { %1248 = vmatpush1.bf16.msra.mxu0 %v2635_v28 }
 0x87b   :  { %1249 = vmatprep.subr.bf16.mxu0 %v2641_v29 }
 0x87e   :  { %1250 = vmatpush1.bf16.msra.mxu0 %v2647_v32 }
 0x87f   :  { %1251 = vmatprep.subr.bf16.mxu0 %v2653_v34 }
 0x882   :  { %1252 = vmatpush1.bf16.msra.mxu0 %v2659_v36 }
 0x883   :  { %1253 = vmatprep.subr.bf16.mxu0 %v2665_v37 }
 0x886   :  { %1254 = vmatpush1.bf16.msra.mxu0 %v2671_v14 }
 0x887   :  { %1255 = vmatprep.subr.bf16.mxu0 %v2677_v15 }
 0x88a   :  { %1256 = vmatpush1.bf16.msra.mxu0 %v2683_v42 }
 0x88d   :  { %1258 = vmatmul.mubr.bf16.vlgmr.msra.gmra.mrb[44].mxu0 %v1181_v54 }
 0x920   :  { %v1560_v4 = vpop.f32.mrb[40].mxu0 }
 0x921   :  { %v1561_v39 = vpop.f32.mrb[41].mxu0 }
 0x922   :  { %v1562_v40 = vadd.f32 %v1561_v39, %v1560_v4  ;;  %v1563_v7 = vpop.f32.mrb[42].mxu0 }
 0x923   :  { %v1564_v10 = vpop.f32.mrb[43].mxu0 }
 0x924   :  { %v1218_v11 = vadd.f32 %v1562_v40, %v2271_v45 }
 0x926   :  { %1410 = vst [vmem:[%s2774_s7 + $0x30] sm:$0xff] %v1218_v11 }
 0x960   :  { %v1259_v60 = vpop.f32.mrb[44].mxu0 }
 0x961   :  { %v1266_v20 = vadd.f32 %v1259_v60, %v2814_v25  ;;  %v1261_v24 = vpop.f32.mrb[45].mxu0 }
 0x962   :  { %v1267_v18 = vadd.f32 %v1261_v24, %v2815_v61  ;;  %v1263_v47 = vpop.f32.mrb[46].mxu0 }
 0x963   :  { %1708 = vtanh.f32 %v1266_v20  ;;  %v1264_v9 = vpop.f32.mrb[47].mxu0 }
 0x964   :  { %1710 = vtanh.f32 %v1267_v18 }
 0x96d   :  { %v1709_v16 = vpop.eup %1708 }
 0x96e   :  { %v1711_v19 = vpop.eup %1710  ;;  %1314 = vst [vmem:[%s2775_s8] sm:$0xff] %v1709_v16  ;;  %v1270_v55 = vpack.c.bf16 %v1709_v16, %v1709_v16 }
 0x96f   :  { %1315 = vst [vmem:[%s2775_s8 + $0x8] sm:$0xff] %v1711_v19  ;;  %v1271_v22 = vpack.c.bf16 %v1711_v19, %v1711_v19 }
 0x971   :  { %1304 = vmatprep.mubr.bf16.mxu1 %v1271_v22 }
 0x972   :  { %1305 = vmatmul.mubr.bf16.vlgmr.msra.gmra.mrb[28].mxu1 %v1270_v55 }
 0xa45   :  { %v1582_v56 = vpop.f32.mrb[28].mxu1 }
 0xa46   :  { %v1583_v57 = vpop.f32.mrb[29].mxu1 }
 0xa47   :  { %v1584_v58 = vadd.f32 %v1583_v57, %v1582_v56  ;;  %v1585_v59 = vpop.f32.mrb[30].mxu1 }
 0xa48   :  { %v1586_v62 = vpop.f32.mrb[31].mxu1 }
 0xa49   :  { %v1307_v63 = vadd.f32 %v1584_v58, %v2271_v45 }
 0xa4b   :  { %1411 = vst [vmem:[%s2774_s7 + $0x38] sm:$0xff] %v1307_v63 }

</bundles_post_ra>
